<compile_context>
chip_gen: v6e
topology: v6e:2x2x1
jax: 0.10.0
libtpu: 0.0.40
codegen_flags: <defaults>
</compile_context>

<pallas_src>
import jax
import jax.numpy as jnp
from jax import lax
from jax.experimental import pallas as pl
from jax.experimental.pallas import tpu as pltpu


def bridge_down_kernel(x_ref, w_ref, b_ref, o_ref, pad_ref):
    # x_ref:   (bt, 2, 2, Hp, Wp, Cin)  -- the 4 taps of each 2x2 pool window
    # w_ref:   (9, Cin, Cout)           -- conv weight, taps flattened (kh*3+kw)
    # b_ref:   (1, Cout)
    # o_ref:   (bt, Hp, Wp, Cout)
    # pad_ref: (bt, Hp+2, Wp+2, Cin) f32 VMEM scratch (zero-halo buffer)
    bt, Hp2, Wp2, Cin = pad_ref.shape
    Hp, Wp = Hp2 - 2, Wp2 - 2
    Cout = o_ref.shape[-1]
    M = bt * Hp * Wp

    # ---- 2x2 max pool: elementwise max of the 4 window taps (VPU) ----
    pooled = jnp.maximum(
        jnp.maximum(x_ref[:, 0, 0], x_ref[:, 0, 1]),
        jnp.maximum(x_ref[:, 1, 0], x_ref[:, 1, 1]),
    )  # (bt, Hp, Wp, Cin)

    # ---- zero-halo buffer: re-zero only the 1-pixel border strips ----
    zero_row = jnp.zeros((bt, 1, Wp2, Cin), jnp.float32)
    zero_col = jnp.zeros((bt, Hp2, 1, Cin), jnp.float32)
    pad_ref[:, pl.ds(0, 1), :, :] = zero_row
    pad_ref[:, pl.ds(Hp + 1, 1), :, :] = zero_row
    pad_ref[:, :, pl.ds(0, 1), :] = zero_col
    pad_ref[:, :, pl.ds(Wp + 1, 1), :] = zero_col
    # interior is fully overwritten every step
    pad_ref[:, pl.ds(1, Hp), pl.ds(1, Wp), :] = pooled.astype(jnp.float32)

    # ---- hoisted parameter loads (stay resident across the tap loop) ----
    w = w_ref[...]        # (9, Cin, Cout)
    bias = b_ref[...]     # (1, Cout)

    # ---- 3x3 "same" conv: 9 whole-tile matmuls into one (M, Cout) accumulator
    acc = jnp.zeros((M, Cout), jnp.float32)
    for k in range(9):                      # static unroll -> 9 MXU pushes
        dh, dw = k // 3, k % 3
        win = pad_ref[:, pl.ds(dh, Hp), pl.ds(dw, Wp), :]   # (bt, Hp, Wp, Cin)
        acc = acc + jnp.dot(win.reshape(M, Cin), w[k],
                            preferred_element_type=jnp.float32)

    # ---- bias + ReLU, single whole-tile store ----
    out = jnp.maximum(acc + bias, 0.0)
    o_ref[...] = out.reshape(bt, Hp, Wp, Cout).astype(o_ref.dtype)


def bridge_down(x_nchw, w_oihw, bias, *, batch_block=None):
    """Pallas BridgeDown.forward (maxpool2x2 -> conv3x3 same -> ReLU). NCHW in/out."""
    B, Cin, H, W = x_nchw.shape
    Cout = w_oihw.shape[0]
    assert H % 2 == 0 and W % 2 == 0, "kernel assumes even H, W (MaxPool2d(2))"
    Hp, Wp = H // 2, W // 2
    bt = B if batch_block is None else batch_block
    assert B % bt == 0

    # Layout glue (tiny, fused XLA ops): NCHW -> NHWC and split the 2x2 pool
    # taps.  In a real NHWC pipeline (Cin/Cout >= 128) these transposes vanish.
    x_nhwc = jnp.transpose(x_nchw, (0, 2, 3, 1))                  # (B,H,W,C)
    x_taps = x_nhwc.reshape(B, Hp, 2, Wp, 2, Cin)
    x_taps = jnp.transpose(x_taps, (0, 2, 4, 1, 3, 5))            # (B,2,2,Hp,Wp,C)

    # conv weight: (Cout,Cin,3,3) -> (kh,kw,Cin,Cout) -> (9,Cin,Cout)
    w_k = jnp.transpose(w_oihw, (2, 3, 1, 0)).reshape(9, Cin, Cout)
    b_k = bias.reshape(1, Cout)

    out_nhwc = pl.pallas_call(
        bridge_down_kernel,
        out_shape=jax.ShapeDtypeStruct((B, Hp, Wp, Cout), x_nchw.dtype),
        grid=(B // bt,),
        in_specs=[
            pl.BlockSpec((bt, 2, 2, Hp, Wp, Cin), lambda b: (b, 0, 0, 0, 0, 0)),
            pl.BlockSpec((9, Cin, Cout), lambda b: (0, 0, 0)),
            pl.BlockSpec((1, Cout), lambda b: (0, 0)),
        ],
        out_specs=pl.BlockSpec((bt, Hp, Wp, Cout), lambda b: (b, 0, 0, 0)),
        scratch_shapes=[pltpu.VMEM((bt, Hp + 2, Wp + 2, Cin), jnp.float32)],
        compiler_params=pltpu.CompilerParams(
            dimension_semantics=("parallel",)),
    )(x_taps, w_k, b_k)

    # back to NCHW to match the PyTorch module's output convention
    return jnp.transpose(out_nhwc, (0, 3, 1, 2))


def bridge_down_reference(x_nchw, w_oihw, bias):
    """Pure-JAX reference (maxpool2x2 -> conv3x3 same -> ReLU), NCHW in/out."""
    B, Cin, H, W = x_nchw.shape
    Hp, Wp = H // 2, W // 2
    x_nhwc = jnp.transpose(x_nchw, (0, 2, 3, 1))
    pooled = x_nhwc.reshape(B, Hp, 2, Wp, 2, Cin).max(axis=(2, 4))
    w_hwio = jnp.transpose(w_oihw, (2, 3, 1, 0))
    conv = lax.conv_general_dilated(
        pooled, w_hwio, window_strides=(1, 1), padding="SAME",
        dimension_numbers=("NHWC", "HWIO", "NHWC"),
        precision=lax.Precision.HIGHEST)
    out = jnp.maximum(conv + bias[None, None, None, :], 0.0)
    return jnp.transpose(out, (0, 3, 1, 2))


if __name__ == "__main__":
    B, Cin, Cout, H, W = 2, 4, 8, 16, 16

    key = jax.random.PRNGKey(0)
    kx, kw, kb = jax.random.split(key, 3)
    x = jax.random.normal(kx, (B, Cin, H, W), jnp.float32)
    # deterministic synthetic parameters (Conv2d(in=4, out=8, k=3) shapes)
    w = 0.1 * jax.random.normal(kw, (Cout, Cin, 3, 3), jnp.float32)
    bias = 0.1 * jax.random.normal(kb, (Cout,), jnp.float32)

    out = jax.block_until_ready(bridge_down(x, w, bias))
    ref = bridge_down_reference(x, w, bias)

    assert out.shape == (B, Cout, H // 2, W // 2), out.shape
    # 2e-2 tolerance: robust to the MXU's default f32 pass strategy on any
    # chip; structural bugs produce errors orders of magnitude larger.
    assert jnp.allclose(out, ref, atol=2e-2, rtol=2e-2), float(
        jnp.max(jnp.abs(out - ref)))

    print("KERNEL_OK")
</pallas_src>

<mosaic_0001>
module attributes {stable_mosaic.version = 11 : i64} {
  func.func @bridge_down_kernel(%arg0: i32, %arg1: memref<2x2x2x8x8x4xf32, #tpu.memory_space<vmem>>, %arg2: memref<9x4x8xf32, #tpu.memory_space<vmem>>, %arg3: memref<1x8xf32, #tpu.memory_space<vmem>>, %arg4: memref<2x8x8x8xf32, #tpu.memory_space<vmem>>, %arg5: memref<2x10x10x4xf32, #tpu.memory_space<vmem>>) attributes {dimension_semantics = [#tpu.dimension_semantics<parallel>], iteration_bounds = array<i64: 1>, scalar_prefetch = 0 : i64, scratch_operands = 1 : i64, tpu.core_type = #tpu.core_type<tc>, window_params = [{transform_indices = @transform_0, window_bounds = array<i64: 2, 2, 2, 8, 8, 4>}, {pipeline_mode = #tpu.pipeline_mode<synchronous>, transform_indices = @transform_1, window_bounds = array<i64: 9, 4, 8>}, {pipeline_mode = #tpu.pipeline_mode<synchronous>, transform_indices = @transform_2, window_bounds = array<i64: 1, 8>}, {transform_indices = @transform_3, window_bounds = array<i64: 2, 8, 8, 8>}]} {
    %c0 = arith.constant 0 : index
    %c0_0 = arith.constant 0 : index
    %c0_1 = arith.constant 0 : index
    %c0_2 = arith.constant 0 : index
    %c0_3 = arith.constant 0 : index
    %c0_4 = arith.constant 0 : index
    %0 = vector.load %arg1[%c0, %c0_0, %c0_1, %c0_2, %c0_3, %c0_4] : memref<2x2x2x8x8x4xf32, #tpu.memory_space<vmem>>, vector<2x1x1x8x8x4xf32>
    %1 = vector.shape_cast %0 : vector<2x1x1x8x8x4xf32> to vector<2x8x8x4xf32>
    %c0_5 = arith.constant 0 : index
    %c0_6 = arith.constant 0 : index
    %c1 = arith.constant 1 : index
    %c0_7 = arith.constant 0 : index
    %c0_8 = arith.constant 0 : index
    %c0_9 = arith.constant 0 : index
    %2 = vector.load %arg1[%c0_5, %c0_6, %c1, %c0_7, %c0_8, %c0_9] : memref<2x2x2x8x8x4xf32, #tpu.memory_space<vmem>>, vector<2x1x1x8x8x4xf32>
    %3 = vector.shape_cast %2 : vector<2x1x1x8x8x4xf32> to vector<2x8x8x4xf32>
    %4 = arith.maximumf %1, %3 : vector<2x8x8x4xf32>
    %c0_10 = arith.constant 0 : index
    %c1_11 = arith.constant 1 : index
    %c0_12 = arith.constant 0 : index
    %c0_13 = arith.constant 0 : index
    %c0_14 = arith.constant 0 : index
    %c0_15 = arith.constant 0 : index
    %5 = vector.load %arg1[%c0_10, %c1_11, %c0_12, %c0_13, %c0_14, %c0_15] : memref<2x2x2x8x8x4xf32, #tpu.memory_space<vmem>>, vector<2x1x1x8x8x4xf32>
    %6 = vector.shape_cast %5 : vector<2x1x1x8x8x4xf32> to vector<2x8x8x4xf32>
    %c0_16 = arith.constant 0 : index
    %c1_17 = arith.constant 1 : index
    %c1_18 = arith.constant 1 : index
    %c0_19 = arith.constant 0 : index
    %c0_20 = arith.constant 0 : index
    %c0_21 = arith.constant 0 : index
    %7 = vector.load %arg1[%c0_16, %c1_17, %c1_18, %c0_19, %c0_20, %c0_21] : memref<2x2x2x8x8x4xf32, #tpu.memory_space<vmem>>, vector<2x1x1x8x8x4xf32>
    %8 = vector.shape_cast %7 : vector<2x1x1x8x8x4xf32> to vector<2x8x8x4xf32>
    %9 = arith.maximumf %6, %8 : vector<2x8x8x4xf32>
    %10 = arith.maximumf %4, %9 : vector<2x8x8x4xf32>
    %cst = arith.constant 0.000000e+00 : f32
    %11 = vector.broadcast %cst : f32 to vector<2x1x10x4xf32>
    %cst_22 = arith.constant 0.000000e+00 : f32
    %12 = vector.broadcast %cst_22 : f32 to vector<2x10x1x4xf32>
    %c0_23 = arith.constant 0 : index
    %c0_24 = arith.constant 0 : index
    %c0_25 = arith.constant 0 : index
    %c0_26 = arith.constant 0 : index
    %13 = vector.load %arg5[%c0_23, %c0_24, %c0_25, %c0_26] : memref<2x10x10x4xf32, #tpu.memory_space<vmem>>, vector<2x1x10x4xf32>
    tpu.vector_store %arg5[%c0_23, %c0_24, %c0_25, %c0_26], %11 {strides = array<i32>} : memref<2x10x10x4xf32, #tpu.memory_space<vmem>>, vector<2x1x10x4xf32>,
    %c0_27 = arith.constant 0 : index
    %c9 = arith.constant 9 : index
    %c0_28 = arith.constant 0 : index
    %c0_29 = arith.constant 0 : index
    %14 = vector.load %arg5[%c0_27, %c9, %c0_28, %c0_29] : memref<2x10x10x4xf32, #tpu.memory_space<vmem>>, vector<2x1x10x4xf32>
    tpu.vector_store %arg5[%c0_27, %c9, %c0_28, %c0_29], %11 {strides = array<i32>} : memref<2x10x10x4xf32, #tpu.memory_space<vmem>>, vector<2x1x10x4xf32>,
    %c0_30 = arith.constant 0 : index
    %c0_31 = arith.constant 0 : index
    %c0_32 = arith.constant 0 : index
    %c0_33 = arith.constant 0 : index
    %15 = vector.load %arg5[%c0_30, %c0_31, %c0_32, %c0_33] : memref<2x10x10x4xf32, #tpu.memory_space<vmem>>, vector<2x10x1x4xf32>
    tpu.vector_store %arg5[%c0_30, %c0_31, %c0_32, %c0_33], %12 {strides = array<i32>} : memref<2x10x10x4xf32, #tpu.memory_space<vmem>>, vector<2x10x1x4xf32>,
    %c0_34 = arith.constant 0 : index
    %c0_35 = arith.constant 0 : index
    %c9_36 = arith.constant 9 : index
    %c0_37 = arith.constant 0 : index
    %16 = vector.load %arg5[%c0_34, %c0_35, %c9_36, %c0_37] : memref<2x10x10x4xf32, #tpu.memory_space<vmem>>, vector<2x10x1x4xf32>
    tpu.vector_store %arg5[%c0_34, %c0_35, %c9_36, %c0_37], %12 {strides = array<i32>} : memref<2x10x10x4xf32, #tpu.memory_space<vmem>>, vector<2x10x1x4xf32>,
    %c0_38 = arith.constant 0 : index
    %c1_39 = arith.constant 1 : index
    %c1_40 = arith.constant 1 : index
    %c0_41 = arith.constant 0 : index
    %17 = vector.load %arg5[%c0_38, %c1_39, %c1_40, %c0_41] : memref<2x10x10x4xf32, #tpu.memory_space<vmem>>, vector<2x8x8x4xf32>
    tpu.vector_store %arg5[%c0_38, %c1_39, %c1_40, %c0_41], %10 {strides = array<i32>} : memref<2x10x10x4xf32, #tpu.memory_space<vmem>>, vector<2x8x8x4xf32>,
    %c0_42 = arith.constant 0 : index
    %c0_43 = arith.constant 0 : index
    %c0_44 = arith.constant 0 : index
    %18 = vector.load %arg2[%c0_42, %c0_43, %c0_44] : memref<9x4x8xf32, #tpu.memory_space<vmem>>, vector<9x4x8xf32>
    %c0_45 = arith.constant 0 : index
    %c0_46 = arith.constant 0 : index
    %19 = vector.load %arg3[%c0_45, %c0_46] : memref<1x8xf32, #tpu.memory_space<vmem>>, vector<1x8xf32>
    %cst_47 = arith.constant 0.000000e+00 : f32
    %20 = vector.broadcast %cst_47 : f32 to vector<128x8xf32>
    %c0_48 = arith.constant 0 : index
    %c0_49 = arith.constant 0 : index
    %c0_50 = arith.constant 0 : index
    %c0_51 = arith.constant 0 : index
    %21 = vector.load %arg5[%c0_48, %c0_49, %c0_50, %c0_51] : memref<2x10x10x4xf32, #tpu.memory_space<vmem>>, vector<2x8x8x4xf32>
    %22 = vector.shape_cast %21 : vector<2x8x8x4xf32> to vector<128x4xf32>
    %23 = vector.extract_strided_slice %18 {offsets = [0, 0, 0], sizes = [1, 4, 8], strides = [1, 1, 1]} : vector<9x4x8xf32> to vector<1x4x8xf32>
    %24 = vector.shape_cast %23 : vector<1x4x8xf32> to vector<4x8xf32>
    %cst_52 = arith.constant dense<0.000000e+00> : vector<128x8xf32>
    %25 = tpu.matmul %22, %24, %cst_52 {dimension_numbers = #tpu.dot_dimension_numbers<[1], [0], [0], [1], [0, 0, 1, 1], [], []>} : vector<128x4xf32>, vector<4x8xf32>, vector<128x8xf32> -> vector<128x8xf32>
    %26 = arith.addf %20, %25 : vector<128x8xf32>
    %c0_53 = arith.constant 0 : index
    %c0_54 = arith.constant 0 : index
    %c1_55 = arith.constant 1 : index
    %c0_56 = arith.constant 0 : index
    %27 = vector.load %arg5[%c0_53, %c0_54, %c1_55, %c0_56] : memref<2x10x10x4xf32, #tpu.memory_space<vmem>>, vector<2x8x8x4xf32>
    %28 = vector.shape_cast %27 : vector<2x8x8x4xf32> to vector<128x4xf32>
    %29 = vector.extract_strided_slice %18 {offsets = [1, 0, 0], sizes = [1, 4, 8], strides = [1, 1, 1]} : vector<9x4x8xf32> to vector<1x4x8xf32>
    %30 = vector.shape_cast %29 : vector<1x4x8xf32> to vector<4x8xf32>
    %cst_57 = arith.constant dense<0.000000e+00> : vector<128x8xf32>
    %31 = tpu.matmul %28, %30, %cst_57 {dimension_numbers = #tpu.dot_dimension_numbers<[1], [0], [0], [1], [0, 0, 1, 1], [], []>} : vector<128x4xf32>, vector<4x8xf32>, vector<128x8xf32> -> vector<128x8xf32>
    %32 = arith.addf %26, %31 : vector<128x8xf32>
    %c0_58 = arith.constant 0 : index
    %c0_59 = arith.constant 0 : index
    %c2 = arith.constant 2 : index
    %c0_60 = arith.constant 0 : index
    %33 = vector.load %arg5[%c0_58, %c0_59, %c2, %c0_60] : memref<2x10x10x4xf32, #tpu.memory_space<vmem>>, vector<2x8x8x4xf32>
    %34 = vector.shape_cast %33 : vector<2x8x8x4xf32> to vector<128x4xf32>
    %35 = vector.extract_strided_slice %18 {offsets = [2, 0, 0], sizes = [1, 4, 8], strides = [1, 1, 1]} : vector<9x4x8xf32> to vector<1x4x8xf32>
    %36 = vector.shape_cast %35 : vector<1x4x8xf32> to vector<4x8xf32>
    %cst_61 = arith.constant dense<0.000000e+00> : vector<128x8xf32>
    %37 = tpu.matmul %34, %36, %cst_61 {dimension_numbers = #tpu.dot_dimension_numbers<[1], [0], [0], [1], [0, 0, 1, 1], [], []>} : vector<128x4xf32>, vector<4x8xf32>, vector<128x8xf32> -> vector<128x8xf32>
    %38 = arith.addf %32, %37 : vector<128x8xf32>
    %c0_62 = arith.constant 0 : index
    %c1_63 = arith.constant 1 : index
    %c0_64 = arith.constant 0 : index
    %c0_65 = arith.constant 0 : index
    %39 = vector.load %arg5[%c0_62, %c1_63, %c0_64, %c0_65] : memref<2x10x10x4xf32, #tpu.memory_space<vmem>>, vector<2x8x8x4xf32>
    %40 = vector.shape_cast %39 : vector<2x8x8x4xf32> to vector<128x4xf32>
    %41 = vector.extract_strided_slice %18 {offsets = [3, 0, 0], sizes = [1, 4, 8], strides = [1, 1, 1]} : vector<9x4x8xf32> to vector<1x4x8xf32>
    %42 = vector.shape_cast %41 : vector<1x4x8xf32> to vector<4x8xf32>
    %cst_66 = arith.constant dense<0.000000e+00> : vector<128x8xf32>
    %43 = tpu.matmul %40, %42, %cst_66 {dimension_numbers = #tpu.dot_dimension_numbers<[1], [0], [0], [1], [0, 0, 1, 1], [], []>} : vector<128x4xf32>, vector<4x8xf32>, vector<128x8xf32> -> vector<128x8xf32>
    %44 = arith.addf %38, %43 : vector<128x8xf32>
    %c0_67 = arith.constant 0 : index
    %c1_68 = arith.constant 1 : index
    %c1_69 = arith.constant 1 : index
    %c0_70 = arith.constant 0 : index
    %45 = vector.load %arg5[%c0_67, %c1_68, %c1_69, %c0_70] : memref<2x10x10x4xf32, #tpu.memory_space<vmem>>, vector<2x8x8x4xf32>
    %46 = vector.shape_cast %45 : vector<2x8x8x4xf32> to vector<128x4xf32>
    %47 = vector.extract_strided_slice %18 {offsets = [4, 0, 0], sizes = [1, 4, 8], strides = [1, 1, 1]} : vector<9x4x8xf32> to vector<1x4x8xf32>
    %48 = vector.shape_cast %47 : vector<1x4x8xf32> to vector<4x8xf32>
    %cst_71 = arith.constant dense<0.000000e+00> : vector<128x8xf32>
    %49 = tpu.matmul %46, %48, %cst_71 {dimension_numbers = #tpu.dot_dimension_numbers<[1], [0], [0], [1], [0, 0, 1, 1], [], []>} : vector<128x4xf32>, vector<4x8xf32>, vector<128x8xf32> -> vector<128x8xf32>
    %50 = arith.addf %44, %49 : vector<128x8xf32>
    %c0_72 = arith.constant 0 : index
    %c1_73 = arith.constant 1 : index
    %c2_74 = arith.constant 2 : index
    %c0_75 = arith.constant 0 : index
    %51 = vector.load %arg5[%c0_72, %c1_73, %c2_74, %c0_75] : memref<2x10x10x4xf32, #tpu.memory_space<vmem>>, vector<2x8x8x4xf32>
    %52 = vector.shape_cast %51 : vector<2x8x8x4xf32> to vector<128x4xf32>
    %53 = vector.extract_strided_slice %18 {offsets = [5, 0, 0], sizes = [1, 4, 8], strides = [1, 1, 1]} : vector<9x4x8xf32> to vector<1x4x8xf32>
    %54 = vector.shape_cast %53 : vector<1x4x8xf32> to vector<4x8xf32>
    %cst_76 = arith.constant dense<0.000000e+00> : vector<128x8xf32>
    %55 = tpu.matmul %52, %54, %cst_76 {dimension_numbers = #tpu.dot_dimension_numbers<[1], [0], [0], [1], [0, 0, 1, 1], [], []>} : vector<128x4xf32>, vector<4x8xf32>, vector<128x8xf32> -> vector<128x8xf32>
    %56 = arith.addf %50, %55 : vector<128x8xf32>
    %c0_77 = arith.constant 0 : index
    %c2_78 = arith.constant 2 : index
    %c0_79 = arith.constant 0 : index
    %c0_80 = arith.constant 0 : index
    %57 = vector.load %arg5[%c0_77, %c2_78, %c0_79, %c0_80] : memref<2x10x10x4xf32, #tpu.memory_space<vmem>>, vector<2x8x8x4xf32>
    %58 = vector.shape_cast %57 : vector<2x8x8x4xf32> to vector<128x4xf32>
    %59 = vector.extract_strided_slice %18 {offsets = [6, 0, 0], sizes = [1, 4, 8], strides = [1, 1, 1]} : vector<9x4x8xf32> to vector<1x4x8xf32>
    %60 = vector.shape_cast %59 : vector<1x4x8xf32> to vector<4x8xf32>
    %cst_81 = arith.constant dense<0.000000e+00> : vector<128x8xf32>
    %61 = tpu.matmul %58, %60, %cst_81 {dimension_numbers = #tpu.dot_dimension_numbers<[1], [0], [0], [1], [0, 0, 1, 1], [], []>} : vector<128x4xf32>, vector<4x8xf32>, vector<128x8xf32> -> vector<128x8xf32>
    %62 = arith.addf %56, %61 : vector<128x8xf32>
    %c0_82 = arith.constant 0 : index
    %c2_83 = arith.constant 2 : index
    %c1_84 = arith.constant 1 : index
    %c0_85 = arith.constant 0 : index
    %63 = vector.load %arg5[%c0_82, %c2_83, %c1_84, %c0_85] : memref<2x10x10x4xf32, #tpu.memory_space<vmem>>, vector<2x8x8x4xf32>
    %64 = vector.shape_cast %63 : vector<2x8x8x4xf32> to vector<128x4xf32>
    %65 = vector.extract_strided_slice %18 {offsets = [7, 0, 0], sizes = [1, 4, 8], strides = [1, 1, 1]} : vector<9x4x8xf32> to vector<1x4x8xf32>
    %66 = vector.shape_cast %65 : vector<1x4x8xf32> to vector<4x8xf32>
    %cst_86 = arith.constant dense<0.000000e+00> : vector<128x8xf32>
    %67 = tpu.matmul %64, %66, %cst_86 {dimension_numbers = #tpu.dot_dimension_numbers<[1], [0], [0], [1], [0, 0, 1, 1], [], []>} : vector<128x4xf32>, vector<4x8xf32>, vector<128x8xf32> -> vector<128x8xf32>
    %68 = arith.addf %62, %67 : vector<128x8xf32>
    %c0_87 = arith.constant 0 : index
    %c2_88 = arith.constant 2 : index
    %c2_89 = arith.constant 2 : index
    %c0_90 = arith.constant 0 : index
    %69 = vector.load %arg5[%c0_87, %c2_88, %c2_89, %c0_90] : memref<2x10x10x4xf32, #tpu.memory_space<vmem>>, vector<2x8x8x4xf32>
    %70 = vector.shape_cast %69 : vector<2x8x8x4xf32> to vector<128x4xf32>
    %71 = vector.extract_strided_slice %18 {offsets = [8, 0, 0], sizes = [1, 4, 8], strides = [1, 1, 1]} : vector<9x4x8xf32> to vector<1x4x8xf32>
    %72 = vector.shape_cast %71 : vector<1x4x8xf32> to vector<4x8xf32>
    %cst_91 = arith.constant dense<0.000000e+00> : vector<128x8xf32>
    %73 = tpu.matmul %70, %72, %cst_91 {dimension_numbers = #tpu.dot_dimension_numbers<[1], [0], [0], [1], [0, 0, 1, 1], [], []>} : vector<128x4xf32>, vector<4x8xf32>, vector<128x8xf32> -> vector<128x8xf32>
    %74 = arith.addf %68, %73 : vector<128x8xf32>
    %75 = vector.broadcast %19 : vector<1x8xf32> to vector<128x8xf32>
    %76 = arith.addf %74, %75 : vector<128x8xf32>
    %cst_92 = arith.constant 0.000000e+00 : f32
    %77 = vector.broadcast %cst_92 : f32 to vector<128x8xf32>
    %78 = arith.maximumf %76, %77 : vector<128x8xf32>
    %79 = vector.shape_cast %78 : vector<128x8xf32> to vector<2x8x8x8xf32>
    %c0_93 = arith.constant 0 : index
    %c0_94 = arith.constant 0 : index
    %c0_95 = arith.constant 0 : index
    %c0_96 = arith.constant 0 : index
    %80 = vector.load %arg4[%c0_93, %c0_94, %c0_95, %c0_96] : memref<2x8x8x8xf32, #tpu.memory_space<vmem>>, vector<2x8x8x8xf32>
    tpu.vector_store %arg4[%c0_93, %c0_94, %c0_95, %c0_96], %79 {strides = array<i32>} : memref<2x8x8x8xf32, #tpu.memory_space<vmem>>, vector<2x8x8x8xf32>,
    return
  }
  func.func @transform_0(%arg0: i32) -> (i32, i32, i32, i32, i32, i32) {
    %c0_i32 = arith.constant 0 : i32
    %c0_i32_0 = arith.constant 0 : i32
    %c0_i32_1 = arith.constant 0 : i32
    %c0_i32_2 = arith.constant 0 : i32
    %c0_i32_3 = arith.constant 0 : i32
    %c0_i32_4 = arith.constant 0 : i32
    return %arg0, %c0_i32, %c0_i32_0, %c0_i32_1, %c0_i32_2, %c0_i32_3 : i32, i32, i32, i32, i32, i32
  }
  func.func @transform_1(%arg0: i32) -> (i32, i32, i32) {
    %c0_i32 = arith.constant 0 : i32
    %c0_i32_0 = arith.constant 0 : i32
    %c0_i32_1 = arith.constant 0 : i32
    %c0_i32_2 = arith.constant 0 : i32
    return %c0_i32, %c0_i32_0, %c0_i32_1 : i32, i32, i32
  }
  func.func @transform_2(%arg0: i32) -> (i32, i32) {
    %c0_i32 = arith.constant 0 : i32
    %c0_i32_0 = arith.constant 0 : i32
    %c0_i32_1 = arith.constant 0 : i32
    return %c0_i32, %c0_i32_0 : i32, i32
  }
  func.func @transform_3(%arg0: i32) -> (i32, i32, i32, i32) {
    %c0_i32 = arith.constant 0 : i32
    %c0_i32_0 = arith.constant 0 : i32
    %c0_i32_1 = arith.constant 0 : i32
    %c0_i32_2 = arith.constant 0 : i32
    return %arg0, %c0_i32, %c0_i32_0, %c0_i32_1 : i32, i32, i32, i32
  }
}

</mosaic_0001>

<bundles_post_ra>
// kernel: tpu_custom_call.1
= control target key start
LH: loop header
LB: loop body
LE: loop exit
PB: predicated region body
PF: predicated region fallthrough
CT: control target
= control target key end

     0   :  { %vm289_vm0 = vcmask 1043456   ;;  %vm130_vm1 = vcmask 31744   ;;  %vm132_vm2 = vcmask 25600   ;;  %v2919_v1 = vmov 0.0   ;;  %s3839_s0 = inlined_call_operand.vmem [shape: f32[2,2,2,8,8,4], index: 0, kind: input, shape index: {}]   ;;  %s3840_s1 = inlined_call_operand.vmem [shape: f32[9,4,8], index: 1, kind: input, shape index: {}]   ;;  %s3841_s2 = inlined_call_operand.vmem [shape: f32[1,8], index: 2, kind: input, shape index: {}]   ;;  %s3842_s3 = inlined_call_operand.hbm [shape: f32[2,8,8,8], index: 3, kind: output, shape index: {}]  }
   0x1   :  { %v200_v0 = vld [vmem:[%s3840_s1 + $0x4] sm:$0xf]  ;;  %131 = vst.msk [vmem:[#allocation2] sm:$0xff] %vm130_vm1, %v2919_v1  ;;  %vm141_vm3 = vcmask 24576   ;;  %134 = vst.msk [vmem:[#allocation2 + $0xa0] sm:$0xff] %vm130_vm1, %v2919_v1  ;;  %v16_v16 = vld [vmem:[%s3839_s0 + $0x8] sm:$0xff] }
   0x2   :  { %2891 = vmatprep.subr.msk.mxu1 %vm289_vm0, %v200_v0  ;;  %2657 = vmatprep.subr.msk.mxu0 %vm289_vm0, %v200_v0  ;;  %133 = vst.msk [vmem:[#allocation2 + $0x8] sm:$0x3] %vm132_vm2, %v2919_v1  ;;  %135 = vst.msk [vmem:[#allocation2 + $0xa8] sm:$0x3] %vm132_vm2, %v2919_v1  ;;  %v2955_v2 = vld [vmem:[%s3840_s1] sm:$0xf] }
   0x3   :  { %137 = vst.msk [vmem:[#allocation2 + $0x90] sm:$0xff] %vm130_vm1, %v2919_v1  ;;  %139 = vst.msk [vmem:[#allocation2 + $0x130] sm:$0xff] %vm130_vm1, %v2919_v1  ;;  %v15_v3 = vld [vmem:[%s3839_s0] sm:$0xff]  ;;  %2892 = vmatpush3.msk.msra.mxu1 %vm289_vm0, %v200_v0  ;;  %2658 = vmatpush3.msk.msra.mxu0 %vm289_vm0, %v200_v0  ;;  %v3028_v15 = vld [vmem:[%s3840_s1 + $0x8] sm:$0xf] }
   0x4   :  { %138 = vst.msk [vmem:[#allocation2 + $0x98] sm:$0x3] %vm132_vm2, %v2919_v1  ;;  %140 = vst.msk [vmem:[#allocation2 + $0x138] sm:$0x3] %vm132_vm2, %v2919_v1  ;;  %v2302_v4 = vld [vmem:[%s3839_s0 + $0x40] sm:$0xff]  ;;  %2683 = vmatprep.subr.msk.mxu1 %vm289_vm0, %v2955_v2  ;;  %v2303_v17 = vld [vmem:[%s3839_s0 + $0x48] sm:$0xff]  ;;  %2709 = vmatprep.subr.msk.mxu0 %vm289_vm0, %v3028_v15 }
   0x5   :  { %162 = vst.msk [vmem:[#allocation2 + $0x9] sm:$0x1] %vm141_vm3, %v2919_v1  ;;  %142 = vst.msk [vmem:[#allocation2] sm:$0x1] %vm141_vm3, %v2919_v1  ;;  %v48_v5 = vmax.f32 %v15_v3, %v2302_v4  ;;  %v2318_v6 = vld [vmem:[%s3839_s0 + $0x80] sm:$0xff]  ;;  %v49_v19 = vmax.f32 %v16_v16, %v2303_v17  ;;  %v2319_v20 = vld [vmem:[%s3839_s0 + $0x88] sm:$0xff] }
   0x6   :  { %143 = vst.msk [vmem:[#allocation2 + $0x10] sm:$0x1] %vm141_vm3, %v2919_v1  ;;  %144 = vst.msk [vmem:[#allocation2 + $0x20] sm:$0x1] %vm141_vm3, %v2919_v1  ;;  %v2334_v7 = vld [vmem:[%s3839_s0 + $0xc0] sm:$0xff]  ;;  %v2335_v21 = vld [vmem:[%s3839_s0 + $0xc8] sm:$0xff] }
   0x7   :  { %145 = vst.msk [vmem:[#allocation2 + $0x30] sm:$0x1] %vm141_vm3, %v2919_v1  ;;  %146 = vst.msk [vmem:[#allocation2 + $0x40] sm:$0x1] %vm141_vm3, %v2919_v1  ;;  %v23_v8 = vld [vmem:[%s3839_s0 + $0x100] sm:$0xff]  ;;  %v98_v9 = vmax.f32 %v2318_v6, %v2334_v7  ;;  %v24_v22 = vld [vmem:[%s3839_s0 + $0x108] sm:$0xff]  ;;  %v99_v24 = vmax.f32 %v2319_v20, %v2335_v21 }
   0x8   :  { %147 = vst.msk [vmem:[#allocation2 + $0x50] sm:$0x1] %vm141_vm3, %v2919_v1  ;;  %148 = vst.msk [vmem:[#allocation2 + $0x60] sm:$0x1] %vm141_vm3, %v2919_v1  ;;  %v2310_v10 = vld [vmem:[%s3839_s0 + $0x140] sm:$0xff]  ;;  %v2311_v25 = vld [vmem:[%s3839_s0 + $0x148] sm:$0xff] }
   0x9   :  { %149 = vst.msk [vmem:[#allocation2 + $0x70] sm:$0x1] %vm141_vm3, %v2919_v1  ;;  %150 = vst.msk [vmem:[#allocation2 + $0x80] sm:$0x1] %vm141_vm3, %v2919_v1  ;;  %v2326_v11 = vld [vmem:[%s3839_s0 + $0x180] sm:$0xff]  ;;  %v56_v13 = vmax.f32 %v23_v8, %v2310_v10  ;;  %v114_v18 = vmax.f32 %v48_v5, %v98_v9  ;;  %v2327_v26 = vld [vmem:[%s3839_s0 + $0x188] sm:$0xff]  ;;  %v57_v28 = vmax.f32 %v24_v22, %v2311_v25 }
   0xa   :  { %153 = vst.msk [vmem:[#allocation2 + $0xb0] sm:$0x1] %vm141_vm3, %v2919_v1  ;;  %154 = vst.msk [vmem:[#allocation2 + $0xc0] sm:$0x1] %vm141_vm3, %v2919_v1  ;;  %v2342_v12 = vld [vmem:[%s3839_s0 + $0x1c0] sm:$0xff]  ;;  %v2343_v27 = vld [vmem:[%s3839_s0 + $0x1c8] sm:$0xff]  ;;  %v115_v35 = vmax.f32 %v49_v19, %v99_v24 }
   0xb   :  { %155 = vst.msk [vmem:[#allocation2 + $0xd0] sm:$0x1] %vm141_vm3, %v2919_v1  ;;  %156 = vst.msk [vmem:[#allocation2 + $0xe0] sm:$0x1] %vm141_vm3, %v2919_v1  ;;  %v106_v14 = vmax.f32 %v2326_v11, %v2342_v12  ;;  %v107_v29 = vmax.f32 %v2327_v26, %v2343_v27  ;;  %v17_v30 = vld [vmem:[%s3839_s0 + $0x10] sm:$0xff]  ;;  %v225_v33 = vld [vmem:[#allocation2 + $0x1] sm:$0xff] }
   0xc   :  { %157 = vst.msk [vmem:[#allocation2 + $0xf0] sm:$0x1] %vm141_vm3, %v2919_v1  ;;  %158 = vst.msk [vmem:[#allocation2 + $0x100] sm:$0x1] %vm141_vm3, %v2919_v1  ;;  %v2304_v31 = vld [vmem:[%s3839_s0 + $0x50] sm:$0xff]  ;;  %v233_v34 = vld [vmem:[#allocation2 + $0xa1] sm:$0xff]  ;;  %2659 = vmatprep.mubr.msk.f32.mxu0 %vm130_vm1, %v225_v33 }
   0xd   :  { %159 = vst.msk [vmem:[#allocation2 + $0x110] sm:$0x1] %vm141_vm3, %v2919_v1  ;;  %160 = vst.msk [vmem:[#allocation2 + $0x120] sm:$0x1] %vm141_vm3, %v2919_v1  ;;  %v122_v23 = vmax.f32 %v56_v13, %v106_v14  ;;  %v2320_v32 = vld [vmem:[%s3839_s0 + $0x90] sm:$0xff]  ;;  %v50_v36 = vmax.f32 %v17_v30, %v2304_v31  ;;  %2671 = vmatprep.mubr.msk.f32.mxu1 %vm130_vm1, %v233_v34  ;;  %v123_v38 = vmax.f32 %v57_v28, %v107_v29  ;;  %v18_v45 = vld [vmem:[%s3839_s0 + $0x18] sm:$0xff] }
   0xe   :  { %163 = vst.msk [vmem:[#allocation2 + $0x19] sm:$0x1] %vm141_vm3, %v2919_v1  ;;  %164 = vst.msk [vmem:[#allocation2 + $0x29] sm:$0x1] %vm141_vm3, %v2919_v1  ;;  %v2336_v37 = vld [vmem:[%s3839_s0 + $0xd0] sm:$0xff]  ;;  %v2305_v46 = vld [vmem:[%s3839_s0 + $0x58] sm:$0xff] }
   0xf   :  { %165 = vst.msk [vmem:[#allocation2 + $0x39] sm:$0x1] %vm141_vm3, %v2919_v1  ;;  %166 = vst.msk [vmem:[#allocation2 + $0x49] sm:$0x1] %vm141_vm3, %v2919_v1  ;;  %v100_v39 = vmax.f32 %v2320_v32, %v2336_v37  ;;  %v25_v40 = vld [vmem:[%s3839_s0 + $0x110] sm:$0xff]  ;;  %v51_v49 = vmax.f32 %v18_v45, %v2305_v46  ;;  %v2321_v50 = vld [vmem:[%s3839_s0 + $0x98] sm:$0xff] }
  0x10   :  { %167 = vst.msk [vmem:[#allocation2 + $0x59] sm:$0x1] %vm141_vm3, %v2919_v1  ;;  %168 = vst.msk [vmem:[#allocation2 + $0x69] sm:$0x1] %vm141_vm3, %v2919_v1  ;;  %v2312_v41 = vld [vmem:[%s3839_s0 + $0x150] sm:$0xff]  ;;  %v2337_v51 = vld [vmem:[%s3839_s0 + $0xd8] sm:$0xff] }
  0x11   :  { %169 = vst.msk [vmem:[#allocation2 + $0x79] sm:$0x1] %vm141_vm3, %v2919_v1  ;;  %170 = vst.msk [vmem:[#allocation2 + $0x89] sm:$0x1] %vm141_vm3, %v2919_v1  ;;  %v2328_v42 = vld [vmem:[%s3839_s0 + $0x190] sm:$0xff]  ;;  %v58_v43 = vmax.f32 %v25_v40, %v2312_v41  ;;  %v116_v47 = vmax.f32 %v50_v36, %v100_v39  ;;  %v26_v52 = vld [vmem:[%s3839_s0 + $0x118] sm:$0xff]  ;;  %v101_v53 = vmax.f32 %v2321_v50, %v2337_v51 }
  0x12   :  { %173 = vst.msk [vmem:[#allocation2 + $0xb9] sm:$0x1] %vm141_vm3, %v2919_v1  ;;  %174 = vst.msk [vmem:[#allocation2 + $0xc9] sm:$0x1] %vm141_vm3, %v2919_v1  ;;  %v2344_v44 = vld [vmem:[%s3839_s0 + $0x1d0] sm:$0xff]  ;;  %v2313_v54 = vld [vmem:[%s3839_s0 + $0x158] sm:$0xff] }
  0x13   :  { %175 = vst.msk [vmem:[#allocation2 + $0xd9] sm:$0x1] %vm141_vm3, %v2919_v1  ;;  %176 = vst.msk [vmem:[#allocation2 + $0xe9] sm:$0x1] %vm141_vm3, %v2919_v1  ;;  %v108_v48 = vmax.f32 %v2328_v42, %v2344_v44  ;;  %v2329_v55 = vld [vmem:[%s3839_s0 + $0x198] sm:$0xff]  ;;  %v59_v58 = vmax.f32 %v26_v52, %v2313_v54  ;;  %v19_v60 = vld [vmem:[%s3839_s0 + $0x20] sm:$0xff]  ;;  %v117_v0 = vmax.f32 %v51_v49, %v101_v53 }
  0x14   :  { %177 = vst.msk [vmem:[#allocation2 + $0xf9] sm:$0x1] %vm141_vm3, %v2919_v1  ;;  %178 = vst.msk [vmem:[#allocation2 + $0x109] sm:$0x1] %vm141_vm3, %v2919_v1  ;;  %v2345_v56 = vld [vmem:[%s3839_s0 + $0x1d8] sm:$0xff]  ;;  %v2306_v61 = vld [vmem:[%s3839_s0 + $0x60] sm:$0xff] }
  0x15   :  { %179 = vst.msk [vmem:[#allocation2 + $0x119] sm:$0x1] %vm141_vm3, %v2919_v1  ;;  %180 = vst.msk [vmem:[#allocation2 + $0x129] sm:$0x1] %vm141_vm3, %v2919_v1  ;;  %v124_v57 = vmax.f32 %v58_v43, %v108_v48  ;;  %v109_v59 = vmax.f32 %v2329_v55, %v2345_v56  ;;  %v2322_v62 = vld [vmem:[%s3839_s0 + $0xa0] sm:$0xff]  ;;  %v20_v12 = vld [vmem:[%s3839_s0 + $0x28] sm:$0xff] }
  0x16   :  { %172 = vst.msk [vmem:[#allocation2 + $0xa9] sm:$0x1] %vm141_vm3, %v2919_v1  ;;  %151 = vst.msk [vmem:[#allocation2 + $0x90] sm:$0x1] %vm141_vm3, %v2919_v1  ;;  %v2338_v3 = vld [vmem:[%s3839_s0 + $0xe0] sm:$0xff]  ;;  %v2307_v13 = vld [vmem:[%s3839_s0 + $0x68] sm:$0xff] }
  0x17   :  { %152 = vst.msk [vmem:[#allocation2 + $0xa0] sm:$0x1] %vm141_vm3, %v2919_v1  ;;  %161 = vst.msk [vmem:[#allocation2 + $0x130] sm:$0x1] %vm141_vm3, %v2919_v1  ;;  %v27_v4 = vld [vmem:[%s3839_s0 + $0x120] sm:$0xff]  ;;  %v125_v6 = vmax.f32 %v59_v58, %v109_v59  ;;  %v102_v7 = vmax.f32 %v2322_v62, %v2338_v3  ;;  %v53_v17 = vmax.f32 %v20_v12, %v2307_v13  ;;  %v2339_v19 = vld [vmem:[%s3839_s0 + $0xe8] sm:$0xff] }
  0x18   :  { %171 = vst.msk [vmem:[#allocation2 + $0x99] sm:$0x1] %vm141_vm3, %v2919_v1  ;;  %181 = vst.msk [vmem:[#allocation2 + $0x139] sm:$0x1] %vm141_vm3, %v2919_v1  ;;  %v52_v1 = vmax.f32 %v19_v60, %v2306_v61  ;;  %v2314_v8 = vld [vmem:[%s3839_s0 + $0x160] sm:$0xff]  ;;  %v28_v21 = vld [vmem:[%s3839_s0 + $0x128] sm:$0xff] }
  0x19   :  { %183 = vst.msk [vmem:[#allocation2 + $0x11] sm:$0xff] %vm130_vm1, %v114_v18  ;;  %191 = vst.msk [vmem:[#allocation2 + $0xb1] sm:$0xff] %vm130_vm1, %v122_v23  ;;  %v2330_v9 = vld [vmem:[%s3839_s0 + $0x1a0] sm:$0xff]  ;;  %v60_v10 = vmax.f32 %v27_v4, %v2314_v8  ;;  %v2323_v18 = vld [vmem:[%s3839_s0 + $0xa8] sm:$0xff] }
  0x1a   :  { %184 = vst.msk [vmem:[#allocation2 + $0x21] sm:$0xff] %vm130_vm1, %v115_v35  ;;  %192 = vst.msk [vmem:[#allocation2 + $0xc1] sm:$0xff] %vm130_vm1, %v123_v38  ;;  %v2346_v11 = vld [vmem:[%s3839_s0 + $0x1e0] sm:$0xff]  ;;  %v2315_v22 = vld [vmem:[%s3839_s0 + $0x168] sm:$0xff] }
  0x1b   :  { %185 = vst.msk [vmem:[#allocation2 + $0x31] sm:$0xff] %vm130_vm1, %v116_v47  ;;  %193 = vst.msk [vmem:[#allocation2 + $0xd1] sm:$0xff] %vm130_vm1, %v124_v57  ;;  %v110_v16 = vmax.f32 %v2330_v9, %v2346_v11  ;;  %v61_v24 = vmax.f32 %v28_v21, %v2315_v22  ;;  %v2331_v25 = vld [vmem:[%s3839_s0 + $0x1a8] sm:$0xff]  ;;  %v21_v27 = vld [vmem:[%s3839_s0 + $0x30] sm:$0xff] }
  0x1c   :  { %186 = vst.msk [vmem:[#allocation2 + $0x41] sm:$0xff] %vm130_vm1, %v117_v0  ;;  %194 = vst.msk [vmem:[#allocation2 + $0xe1] sm:$0xff] %vm130_vm1, %v125_v6  ;;  %v2347_v26 = vld [vmem:[%s3839_s0 + $0x1e8] sm:$0xff]  ;;  %v2308_v31 = vld [vmem:[%s3839_s0 + $0x70] sm:$0xff] }
  0x1d   :  { %v126_v23 = vmax.f32 %v60_v10, %v110_v16  ;;  %v111_v30 = vmax.f32 %v2331_v25, %v2347_v26  ;;  %v2324_v32 = vld [vmem:[%s3839_s0 + $0xb0] sm:$0xff]  ;;  %v54_v33 = vmax.f32 %v21_v27, %v2308_v31  ;;  %v202_v47 = vld [vmem:[%s3840_s1 + $0xc] sm:$0xf]  ;;  %v634_v54 = vld [vmem:[#allocation2 + $0x2] sm:$0xff] }
  0x1e   :  { %v2340_v34 = vld [vmem:[%s3839_s0 + $0xf0] sm:$0xff]  ;;  %v209_v56 = vld [vmem:[#allocation2] sm:$0xff]  ;;  %v22_v3 = vld [vmem:[%s3839_s0 + $0x38] sm:$0xff] }
  0x1f   :  { %195 = vst.msk [vmem:[#allocation2 + $0xf1] sm:$0xff] %vm130_vm1, %v126_v23  ;;  %v29_v35 = vld [vmem:[%s3839_s0 + $0x130] sm:$0xff]  ;;  %v127_v38 = vmax.f32 %v61_v24, %v111_v30  ;;  %v104_v39 = vmax.f32 %v2324_v32, %v2340_v34  ;;  %v2309_v4 = vld [vmem:[%s3839_s0 + $0x78] sm:$0xff] }
  0x20   :  { %v3120_v63 = vld [vmem:[#allocation2 + $0x11] sm:$0xff]  ;;  %v55_v8 = vmax.f32 %v22_v3, %v2309_v4 }
  0x21   :  { %2660 = vmatmul.mubr.msk.f32.vlgmr.msra.gmra.mxu0 %vm130_vm1, %v3120_v63  ;;  %v3130_v5 = vld [vmem:[#allocation2 + $0xb1] sm:$0xff]  ;;  %v3155_v14 = vld [vmem:[#allocation2 + $0x21] sm:$0xff]  ;;  %196 = vst.msk [vmem:[#allocation2 + $0x101] sm:$0xff] %vm130_vm1, %v127_v38  ;;  %v120_v46 = vmax.f32 %v54_v33, %v104_v39 }
  0x22   :  { %2672 = vmatmul.mubr.msk.f32.vlgmr.msra.gmra.mxu1 %vm130_vm1, %v3130_v5  ;;  %2710 = vmatpush3.msk.msra.mxu0 %vm289_vm0, %v3028_v15  ;;  %v118_v15 = vmax.f32 %v52_v1, %v102_v7  ;;  %v3166_v20 = vld [vmem:[#allocation2 + $0xc1] sm:$0xff]  ;;  %v3186_v28 = vld [vmem:[#allocation2 + $0x31] sm:$0xff] }
  0x23   :  { %2684 = vmatpush3.msk.msra.mxu1 %vm289_vm0, %v2955_v2  ;;  %2662 = vmatprep.mubr.msk.f32.mxu0 %vm130_vm1, %v3155_v14  ;;  %v103_v2 = vmax.f32 %v2323_v18, %v2339_v19  ;;  %v2316_v36 = vld [vmem:[%s3839_s0 + $0x170] sm:$0xff]  ;;  %v3217_v43 = vld [vmem:[#allocation2 + $0x41] sm:$0xff]  ;;  %189 = vst.msk [vmem:[#allocation2 + $0x71] sm:$0xff] %vm130_vm1, %v120_v46  ;;  %v3280_v1 = vld [vmem:[%s3840_s1 + $0x18] sm:$0xf] }
  0x24   :  { %2674 = vmatprep.mubr.msk.f32.mxu1 %vm130_vm1, %v3166_v20  ;;  %187 = vst.msk [vmem:[#allocation2 + $0x51] sm:$0xff] %vm130_vm1, %v118_v15  ;;  %v3206_v37 = vld [vmem:[#allocation2 + $0xd1] sm:$0xff]  ;;  %v62_v40 = vmax.f32 %v29_v35, %v2316_v36  ;;  %v3221_v45 = vld [vmem:[#allocation2 + $0xe1] sm:$0xff]  ;;  %2735 = vmatprep.subr.msk.mxu1 %vm289_vm0, %v202_v47 }
  0x25   :  { %v119_v29 = vmax.f32 %v53_v17, %v103_v2  ;;  %2663 = vmatmul.mubr.msk.f32.gmra.mxu0 %vm130_vm1, %v3186_v28  ;;  %v2332_v41 = vld [vmem:[%s3839_s0 + $0x1b0] sm:$0xff]  ;;  %v3266_v60 = vld [vmem:[#allocation2 + $0x20] sm:$0xff]  ;;  %v2325_v6 = vld [vmem:[%s3839_s0 + $0xb8] sm:$0xff] }
  0x26   :  { %v2348_v42 = vld [vmem:[%s3839_s0 + $0x1f0] sm:$0xff]  ;;  %2675 = vmatmul.mubr.msk.f32.gmra.mxu1 %vm130_vm1, %v3206_v37  ;;  %2665 = vmatprep.mubr.msk.f32.mxu0 %vm130_vm1, %v3217_v43  ;;  %v3268_v61 = vld [vmem:[#allocation2 + $0x22] sm:$0xff]  ;;  %v2341_v7 = vld [vmem:[%s3839_s0 + $0xf8] sm:$0xff] }
  0x27   :  { %188 = vst.msk [vmem:[#allocation2 + $0x61] sm:$0xff] %vm130_vm1, %v119_v29  ;;  %v112_v44 = vmax.f32 %v2332_v41, %v2348_v42  ;;  %2677 = vmatprep.mubr.msk.f32.mxu1 %vm130_vm1, %v3221_v45  ;;  %v203_v49 = vld [vmem:[%s3840_s1 + $0x10] sm:$0xf]  ;;  %v3275_v0 = vld [vmem:[%s3840_s1 + $0x14] sm:$0xf]  ;;  %v105_v9 = vmax.f32 %v2325_v6, %v2341_v7  ;;  %v30_v10 = vld [vmem:[%s3839_s0 + $0x138] sm:$0xff] }
  0x28   :  { %2761 = vmatprep.subr.msk.mxu0 %vm289_vm0, %v203_v49  ;;  %v3240_v51 = vld [vmem:[#allocation2 + $0xf1] sm:$0xff]  ;;  %v3248_v53 = vld [vmem:[#allocation2 + $0x101] sm:$0xff] }
  0x29   :  { %v128_v48 = vmax.f32 %v62_v40, %v112_v44  ;;  %v3261_v58 = vld [vmem:[#allocation2 + $0x12] sm:$0xff]  ;;  %v3313_v15 = vld [vmem:[#allocation2 + $0x42] sm:$0xff]  ;;  %v121_v19 = vmax.f32 %v55_v8, %v105_v9 }
  0x2a   :  { %2678 = vmatmul.mubr.msk.f32.gmra.mxu1 %vm130_vm1, %v3240_v51  ;;  %v3252_v55 = vld [vmem:[#allocation2 + $0x71] sm:$0xff]  ;;  %v3320_v18 = vld [vmem:[#allocation2 + $0x40] sm:$0xff] }
  0x2b   :  { %v3233_v50 = vld [vmem:[#allocation2 + $0x51] sm:$0xff]  ;;  %197 = vst.msk [vmem:[#allocation2 + $0x111] sm:$0xff] %vm130_vm1, %v128_v48  ;;  %2680 = vmatprep.mubr.msk.f32.mxu1 %vm130_vm1, %v3248_v53  ;;  %190 = vst.msk [vmem:[#allocation2 + $0x81] sm:$0xff] %vm130_vm1, %v121_v19 }
  0x2c   :  { %2666 = vmatmul.mubr.msk.f32.gmra.mxu0 %vm130_vm1, %v3233_v50  ;;  %v3264_v59 = vld [vmem:[#allocation2 + $0x10] sm:$0xff]  ;;  %v2317_v11 = vld [vmem:[%s3839_s0 + $0x178] sm:$0xff] }
  0x2d   :  { %v3270_v62 = vld [vmem:[#allocation2 + $0x32] sm:$0xff]  ;;  %v63_v16 = vmax.f32 %v30_v10, %v2317_v11 }
  0x2e   :  { %v3244_v52 = vld [vmem:[#allocation2 + $0x61] sm:$0xff]  ;;  %v2333_v12 = vld [vmem:[%s3839_s0 + $0x1b8] sm:$0xff]  ;;  %v3311_v13 = vld [vmem:[#allocation2 + $0x30] sm:$0xff] }
  0x2f   :  { %2668 = vmatprep.mubr.msk.f32.mxu0 %vm130_vm1, %v3244_v52  ;;  %v2349_v17 = vld [vmem:[%s3839_s0 + $0x1f8] sm:$0xff] }
  0x30   :  { %2669 = vmatmul.mubr.msk.f32.gmra.mxu0 %vm130_vm1, %v3252_v55  ;;  %v113_v2 = vmax.f32 %v2333_v12, %v2349_v17  ;;  %v3332_v21 = vld [vmem:[#allocation2 + $0x52] sm:$0xff] }
  0x31   :  { %2711 = vmatprep.mubr.msk.f32.mxu0 %vm130_vm1, %v634_v54 }
  0x32   :  { %v3256_v57 = vld [vmem:[#allocation2 + $0x111] sm:$0xff]  ;;  %v129_v22 = vmax.f32 %v63_v16, %v113_v2 }
  0x33   :  { %2681 = vmatmul.mubr.msk.f32.gmra.mxu1 %vm130_vm1, %v3256_v57 }
  0x34   :  { %2685 = vmatprep.mubr.msk.f32.mxu1 %vm130_vm1, %v209_v56  ;;  %2712 = vmatmul.mubr.msk.f32.vlgmr.msra.gmra.mxu0 %vm130_vm1, %v3261_v58 }
  0x35   :  { %2762 = vmatpush3.msk.msra.mxu0 %vm289_vm0, %v203_v49  ;;  %2714 = vmatprep.mubr.msk.f32.mxu0 %vm130_vm1, %v3268_v61 }
  0x36   :  { %2813 = vmatprep.subr.msk.mxu0 %vm289_vm0, %v3280_v1 }
  0x37   :  { %2686 = vmatmul.mubr.msk.f32.vlgmr.msra.gmra.mxu1 %vm130_vm1, %v3264_v59 }
  0x38   :  { %2736 = vmatpush3.msk.msra.mxu1 %vm289_vm0, %v202_v47  ;;  %2688 = vmatprep.mubr.msk.f32.mxu1 %vm130_vm1, %v3266_v60 }
  0x39   :  { %2787 = vmatprep.subr.msk.mxu1 %vm289_vm0, %v3275_v0  ;;  %2715 = vmatmul.mubr.msk.f32.gmra.mxu0 %vm130_vm1, %v3270_v62 }
  0x3a   :  { %2717 = vmatprep.mubr.msk.f32.mxu0 %vm130_vm1, %v3313_v15 }
  0x3b   :  { %2689 = vmatmul.mubr.msk.f32.gmra.mxu1 %vm130_vm1, %v3311_v13 }
  0x3c   :  { %8 = vsyncpa [#allocation4], 0  ;;  %2691 = vmatprep.mubr.msk.f32.mxu1 %vm130_vm1, %v3320_v18  ;;  %v3337_v23 = vld [vmem:[#allocation2 + $0x50] sm:$0xff]  ;;  %v3339_v24 = vld [vmem:[#allocation2 + $0x62] sm:$0xff]  ;;  %198 = vst.msk [vmem:[#allocation2 + $0x121] sm:$0xff] %vm130_vm1, %v129_v22  ;;  %vm2269_vm4 = vcmask 64512  }
  0x3d   :  { %v3341_v25 = vld [vmem:[#allocation2 + $0x60] sm:$0xff]  ;;  %2718 = vmatmul.mubr.msk.f32.gmra.mxu0 %vm130_vm1, %v3332_v21  ;;  %v3350_v26 = vld [vmem:[#allocation2 + $0x72] sm:$0xff]  ;;  %v206_v48 = vld [vmem:[%s3840_s1 + $0x1c] sm:$0xf] }
  0x3e   :  { %2720 = vmatprep.mubr.msk.f32.mxu0 %vm130_vm1, %v3339_v24  ;;  %v3354_v27 = vld [vmem:[#allocation2 + $0x70] sm:$0xff]  ;;  %v642_v29 = vld [vmem:[#allocation2 + $0xa2] sm:$0xff] }
  0x3f   :  { %2692 = vmatmul.mubr.msk.f32.gmra.mxu1 %vm130_vm1, %v3337_v23  ;;  %v217_v30 = vld [vmem:[#allocation2 + $0xa0] sm:$0xff]  ;;  %v3361_v31 = vld [vmem:[#allocation2 + $0xb2] sm:$0xff] }
  0x40   :  { %2694 = vmatprep.mubr.msk.f32.mxu1 %vm130_vm1, %v3341_v25  ;;  %v218_v32 = vld [vmem:[#allocation2 + $0xb0] sm:$0xff]  ;;  %v3364_v33 = vld [vmem:[#allocation2 + $0xc2] sm:$0xff] }
  0x41   :  { %2721 = vmatmul.mubr.msk.f32.gmra.mxu0 %vm130_vm1, %v3350_v26  ;;  %v3366_v34 = vld [vmem:[#allocation2 + $0xc0] sm:$0xff]  ;;  %v3373_v35 = vld [vmem:[#allocation2 + $0xd2] sm:$0xff] }
  0x42   :  { %2723 = vmatprep.mubr.msk.f32.mxu0 %vm130_vm1, %v642_v29  ;;  %v3377_v36 = vld [vmem:[#allocation2 + $0xd0] sm:$0xff]  ;;  %v3379_v38 = vld [vmem:[#allocation2 + $0xe2] sm:$0xff] }
  0x43   :  { %2695 = vmatmul.mubr.msk.f32.gmra.mxu1 %vm130_vm1, %v3354_v27  ;;  %v3381_v39 = vld [vmem:[#allocation2 + $0xe0] sm:$0xff]  ;;  %v3389_v40 = vld [vmem:[#allocation2 + $0xf2] sm:$0xff] }
  0x44   :  { %2697 = vmatprep.mubr.msk.f32.mxu1 %vm130_vm1, %v217_v30  ;;  %v3393_v41 = vld [vmem:[#allocation2 + $0xf0] sm:$0xff]  ;;  %v3395_v42 = vld [vmem:[#allocation2 + $0x102] sm:$0xff] }
  0x45   :  { %2724 = vmatmul.mubr.msk.f32.gmra.mxu0 %vm130_vm1, %v3361_v31  ;;  %v3397_v44 = vld [vmem:[#allocation2 + $0x100] sm:$0xff]  ;;  %v3405_v46 = vld [vmem:[#allocation2 + $0x112] sm:$0xff] }
  0x46   :  { %2726 = vmatprep.mubr.msk.f32.mxu0 %vm130_vm1, %v3364_v33  ;;  %v3409_v47 = vld [vmem:[#allocation2 + $0x110] sm:$0xff]  ;;  %v3453_v49 = vld [vmem:[#allocation2 + $0x81] sm:$0xff] }
  0x47   :  { %2698 = vmatmul.mubr.msk.f32.gmra.mxu1 %vm130_vm1, %v218_v32  ;;  %v869_v54 = vld [vmem:[#allocation2 + $0x80] sm:$0xff] }
  0x48   :  { %2700 = vmatprep.mubr.msk.f32.mxu1 %vm130_vm1, %v3366_v34  ;;  %v877_v56 = vld [vmem:[#allocation2 + $0x120] sm:$0xff] }
  0x49   :  { %2727 = vmatmul.mubr.msk.f32.gmra.mxu0 %vm130_vm1, %v3373_v35 }
  0x4a   :  { %2729 = vmatprep.mubr.msk.f32.mxu0 %vm130_vm1, %v3379_v38 }
  0x4b   :  { %2701 = vmatmul.mubr.msk.f32.gmra.mxu1 %vm130_vm1, %v3377_v36 }
  0x4c   :  { %2703 = vmatprep.mubr.msk.f32.mxu1 %vm130_vm1, %v3381_v39 }
  0x4d   :  { %2730 = vmatmul.mubr.msk.f32.gmra.mxu0 %vm130_vm1, %v3389_v40 }
  0x4e   :  { %2732 = vmatprep.mubr.msk.f32.mxu0 %vm130_vm1, %v3395_v42 }
  0x4f   :  { %2704 = vmatmul.mubr.msk.f32.gmra.mxu1 %vm130_vm1, %v3393_v41 }
  0x50   :  { %2706 = vmatprep.mubr.msk.f32.mxu1 %vm130_vm1, %v3397_v44 }
  0x51   :  { %2733 = vmatmul.mubr.msk.f32.gmra.mxu0 %vm130_vm1, %v3405_v46 }
  0x52   :  { %2763 = vmatprep.mubr.msk.f32.mxu0 %vm130_vm1, %v3120_v63  ;;  %v207_v63 = vld [vmem:[%s3840_s1 + $0x20] sm:$0xf] }
  0x53   :  { %2707 = vmatmul.mubr.msk.f32.gmra.mxu1 %vm130_vm1, %v3409_v47 }
  0x54   :  { %2737 = vmatprep.mubr.msk.f32.mxu1 %vm130_vm1, %v3264_v59  ;;  %v1325_v59 = vld [vmem:[#allocation2 + $0x82] sm:$0xff] }
  0x55   :  { %2764 = vmatmul.mubr.msk.f32.vlgmr.msra.gmra.mxu0 %vm130_vm1, %v3155_v14 }
  0x56   :  { %2814 = vmatpush3.msk.msra.mxu0 %vm289_vm0, %v3280_v1  ;;  %2766 = vmatprep.mubr.msk.f32.mxu0 %vm130_vm1, %v3186_v28 }
  0x57   :  { %2738 = vmatmul.mubr.msk.f32.vlgmr.msra.gmra.mxu1 %vm130_vm1, %v3266_v60  ;;  %2865 = vmatprep.subr.msk.mxu0 %vm289_vm0, %v207_v63 }
  0x58   :  { %2788 = vmatpush3.msk.msra.mxu1 %vm289_vm0, %v3275_v0  ;;  %2740 = vmatprep.mubr.msk.f32.mxu1 %vm130_vm1, %v3311_v13  ;;  %v1333_v0 = vld [vmem:[#allocation2 + $0x122] sm:$0xff] }
  0x59   :  { %2839 = vmatprep.subr.msk.mxu1 %vm289_vm0, %v206_v48  ;;  %2767 = vmatmul.mubr.msk.f32.gmra.mxu0 %vm130_vm1, %v3217_v43 }
  0x5a   :  { %2769 = vmatprep.mubr.msk.f32.mxu0 %vm130_vm1, %v3233_v50 }
  0x5b   :  { %2741 = vmatmul.mubr.msk.f32.gmra.mxu1 %vm130_vm1, %v3320_v18 }
  0x5c   :  { %2743 = vmatprep.mubr.msk.f32.mxu1 %vm130_vm1, %v3337_v23 }
  0x5d   :  { %2770 = vmatmul.mubr.msk.f32.gmra.mxu0 %vm130_vm1, %v3244_v52 }
  0x5e   :  { %2772 = vmatprep.mubr.msk.f32.mxu0 %vm130_vm1, %v3252_v55 }
  0x5f   :  { %2744 = vmatmul.mubr.msk.f32.gmra.mxu1 %vm130_vm1, %v3341_v25 }
  0x60   :  { %2746 = vmatprep.mubr.msk.f32.mxu1 %vm130_vm1, %v3354_v27 }
  0x61   :  { %2773 = vmatmul.mubr.msk.f32.gmra.mxu0 %vm130_vm1, %v3453_v49 }
  0x62   :  { %2775 = vmatprep.mubr.msk.f32.mxu0 %vm130_vm1, %v3130_v5  ;;  %v3485_v5 = vld [vmem:[#allocation2 + $0x121] sm:$0xff] }
  0x63   :  { %2747 = vmatmul.mubr.msk.f32.gmra.mxu1 %vm130_vm1, %v869_v54 }
  0x64   :  { %2749 = vmatprep.mubr.msk.f32.mxu1 %vm130_vm1, %v218_v32 }
  0x65   :  { %2776 = vmatmul.mubr.msk.f32.gmra.mxu0 %vm130_vm1, %v3166_v20 }
  0x66   :  { %2778 = vmatprep.mubr.msk.f32.mxu0 %vm130_vm1, %v3206_v37 }
  0x67   :  { %2750 = vmatmul.mubr.msk.f32.gmra.mxu1 %vm130_vm1, %v3366_v34 }
  0x68   :  { %2752 = vmatprep.mubr.msk.f32.mxu1 %vm130_vm1, %v3377_v36 }
  0x69   :  { %2779 = vmatmul.mubr.msk.f32.gmra.mxu0 %vm130_vm1, %v3221_v45 }
  0x6a   :  { %2781 = vmatprep.mubr.msk.f32.mxu0 %vm130_vm1, %v3240_v51 }
  0x6b   :  { %2753 = vmatmul.mubr.msk.f32.gmra.mxu1 %vm130_vm1, %v3381_v39 }
  0x6c   :  { %2755 = vmatprep.mubr.msk.f32.mxu1 %vm130_vm1, %v3393_v41 }
  0x6d   :  { %2782 = vmatmul.mubr.msk.f32.gmra.mxu0 %vm130_vm1, %v3248_v53 }
  0x6e   :  { %2784 = vmatprep.mubr.msk.f32.mxu0 %vm130_vm1, %v3256_v57 }
  0x6f   :  { %2756 = vmatmul.mubr.msk.f32.gmra.mxu1 %vm130_vm1, %v3397_v44 }
  0x70   :  { %2758 = vmatprep.mubr.msk.f32.mxu1 %vm130_vm1, %v3409_v47 }
  0x71   :  { %2785 = vmatmul.mubr.msk.f32.gmra.mxu0 %vm130_vm1, %v3485_v5 }
  0x72   :  { %2815 = vmatprep.mubr.msk.f32.mxu0 %vm130_vm1, %v3266_v60  ;;  %v1562_v60 = vld [vmem:[#allocation2 + $0x130] sm:$0xff] }
  0x73   :  { %2759 = vmatmul.mubr.msk.f32.gmra.mxu1 %vm130_vm1, %v877_v56 }
  0x74   :  { %2789 = vmatprep.mubr.msk.f32.mxu1 %vm130_vm1, %v3261_v58  ;;  %v1554_v58 = vld [vmem:[#allocation2 + $0x90] sm:$0xff] }
  0x75   :  { %2816 = vmatmul.mubr.msk.f32.vlgmr.msra.gmra.mxu0 %vm130_vm1, %v3311_v13 }
  0x76   :  { %2866 = vmatpush3.msk.msra.mxu0 %vm289_vm0, %v207_v63  ;;  %2818 = vmatprep.mubr.msk.f32.mxu0 %vm130_vm1, %v3320_v18 }
  0x77   :  { %2790 = vmatmul.mubr.msk.f32.vlgmr.msra.gmra.mxu1 %vm130_vm1, %v3268_v61 }
  0x78   :  { %2840 = vmatpush3.msk.msra.mxu1 %vm289_vm0, %v206_v48  ;;  %2792 = vmatprep.mubr.msk.f32.mxu1 %vm130_vm1, %v3270_v62 }
  0x79   :  { %2819 = vmatmul.mubr.msk.f32.gmra.mxu0 %vm130_vm1, %v3337_v23 }
  0x7a   :  { %2821 = vmatprep.mubr.msk.f32.mxu0 %vm130_vm1, %v3341_v25 }
  0x7b   :  { %2793 = vmatmul.mubr.msk.f32.gmra.mxu1 %vm130_vm1, %v3313_v15 }
  0x7c   :  { %2795 = vmatprep.mubr.msk.f32.mxu1 %vm130_vm1, %v3332_v21 }
  0x7d   :  { %2822 = vmatmul.mubr.msk.f32.gmra.mxu0 %vm130_vm1, %v3354_v27 }
  0x7e   :  { %2824 = vmatprep.mubr.msk.f32.mxu0 %vm130_vm1, %v869_v54 }
  0x7f   :  { %2796 = vmatmul.mubr.msk.f32.gmra.mxu1 %vm130_vm1, %v3339_v24 }
  0x80   :  { %2798 = vmatprep.mubr.msk.f32.mxu1 %vm130_vm1, %v3350_v26 }
  0x81   :  { %2825 = vmatmul.mubr.msk.f32.gmra.mxu0 %vm130_vm1, %v1554_v58 }
  0x82   :  { %2827 = vmatprep.mubr.msk.f32.mxu0 %vm130_vm1, %v3366_v34 }
  0x83   :  { %2799 = vmatmul.mubr.msk.f32.gmra.mxu1 %vm130_vm1, %v1325_v59 }
  0x84   :  { %2801 = vmatprep.mubr.msk.f32.mxu1 %vm130_vm1, %v3361_v31 }
  0x85   :  { %2828 = vmatmul.mubr.msk.f32.gmra.mxu0 %vm130_vm1, %v3377_v36 }
  0x86   :  { %2830 = vmatprep.mubr.msk.f32.mxu0 %vm130_vm1, %v3381_v39 }
  0x87   :  { %2802 = vmatmul.mubr.msk.f32.gmra.mxu1 %vm130_vm1, %v3364_v33 }
  0x88   :  { %2804 = vmatprep.mubr.msk.f32.mxu1 %vm130_vm1, %v3373_v35 }
  0x89   :  { %2831 = vmatmul.mubr.msk.f32.gmra.mxu0 %vm130_vm1, %v3393_v41 }
  0x8a   :  { %2833 = vmatprep.mubr.msk.f32.mxu0 %vm130_vm1, %v3397_v44 }
  0x8b   :  { %2805 = vmatmul.mubr.msk.f32.gmra.mxu1 %vm130_vm1, %v3379_v38 }
  0x8c   :  { %2807 = vmatprep.mubr.msk.f32.mxu1 %vm130_vm1, %v3389_v40 }
  0x8d   :  { %2834 = vmatmul.mubr.msk.f32.gmra.mxu0 %vm130_vm1, %v3409_v47 }
  0x8e   :  { %2836 = vmatprep.mubr.msk.f32.mxu0 %vm130_vm1, %v877_v56 }
  0x8f   :  { %2808 = vmatmul.mubr.msk.f32.gmra.mxu1 %vm130_vm1, %v3395_v42 }
  0x90   :  { %2810 = vmatprep.mubr.msk.f32.mxu1 %vm130_vm1, %v3405_v46 }
  0x91   :  { %2837 = vmatmul.mubr.msk.f32.gmra.mxu0 %vm130_vm1, %v1562_v60 }
  0x92   :  { %2867 = vmatprep.mubr.msk.f32.mxu0 %vm130_vm1, %v3268_v61 }
  0x93   :  { %2811 = vmatmul.mubr.msk.f32.gmra.mxu1 %vm130_vm1, %v1333_v0 }
  0x94   :  { %2841 = vmatprep.mubr.msk.f32.mxu1 %vm130_vm1, %v3155_v14  ;;  %v2010_v14 = vld [vmem:[#allocation2 + $0x92] sm:$0xff] }
  0x95   :  { %2868 = vmatmul.mubr.msk.f32.vlgmr.msra.gmra.mxu0 %vm130_vm1, %v3270_v62 }
  0x96   :  { %2870 = vmatprep.mubr.msk.f32.mxu0 %vm130_vm1, %v3313_v15 }
  0x97   :  { %2842 = vmatmul.mubr.msk.f32.vlgmr.msra.gmra.mxu1 %vm130_vm1, %v3186_v28  ;;  %v1782_v28 = vld [vmem:[#allocation2 + $0x91] sm:$0xff] }
  0x98   :  { %2844 = vmatprep.mubr.msk.f32.mxu1 %vm130_vm1, %v3217_v43 }
  0x99   :  { %2871 = vmatmul.mubr.msk.f32.gmra.mxu0 %vm130_vm1, %v3332_v21 }
  0x9a   :  { %2873 = vmatprep.mubr.msk.f32.mxu0 %vm130_vm1, %v3339_v24 }
  0x9b   :  { %2845 = vmatmul.mubr.msk.f32.gmra.mxu1 %vm130_vm1, %v3233_v50 }
  0x9c   :  { %2847 = vmatprep.mubr.msk.f32.mxu1 %vm130_vm1, %v3244_v52 }
  0x9d   :  { %2874 = vmatmul.mubr.msk.f32.gmra.mxu0 %vm130_vm1, %v3350_v26 }
  0x9e   :  { %2876 = vmatprep.mubr.msk.f32.mxu0 %vm130_vm1, %v1325_v59 }
  0x9f   :  { %2848 = vmatmul.mubr.msk.f32.gmra.mxu1 %vm130_vm1, %v3252_v55 }
  0xa0   :  { %2850 = vmatprep.mubr.msk.f32.mxu1 %vm130_vm1, %v3453_v49 }
  0xa1   :  { %2877 = vmatmul.mubr.msk.f32.gmra.mxu0 %vm130_vm1, %v2010_v14 }
  0xa2   :  { %2879 = vmatprep.mubr.msk.f32.mxu0 %vm130_vm1, %v3364_v33 }
  0xa3   :  { %2851 = vmatmul.mubr.msk.f32.gmra.mxu1 %vm130_vm1, %v1782_v28 }
  0xa4   :  { %2853 = vmatprep.mubr.msk.f32.mxu1 %vm130_vm1, %v3166_v20  ;;  %v2018_v20 = vld [vmem:[#allocation2 + $0x132] sm:$0xff] }
  0xa5   :  { %2880 = vmatmul.mubr.msk.f32.gmra.mxu0 %vm130_vm1, %v3373_v35 }
  0xa6   :  { %2882 = vmatprep.mubr.msk.f32.mxu0 %vm130_vm1, %v3379_v38 }
  0xa7   :  { %2854 = vmatmul.mubr.msk.f32.gmra.mxu1 %vm130_vm1, %v3206_v37  ;;  %v1790_v37 = vld [vmem:[#allocation2 + $0x131] sm:$0xff] }
  0xa8   :  { %2856 = vmatprep.mubr.msk.f32.mxu1 %vm130_vm1, %v3221_v45 }
  0xa9   :  { %2883 = vmatmul.mubr.msk.f32.gmra.mxu0 %vm130_vm1, %v3389_v40 }
  0xaa   :  { %2885 = vmatprep.mubr.msk.f32.mxu0 %vm130_vm1, %v3395_v42 }
  0xab   :  { %2857 = vmatmul.mubr.msk.f32.gmra.mxu1 %vm130_vm1, %v3240_v51 }
  0xac   :  { %2859 = vmatprep.mubr.msk.f32.mxu1 %vm130_vm1, %v3248_v53 }
  0xad   :  { %2886 = vmatmul.mubr.msk.f32.gmra.mxu0 %vm130_vm1, %v3405_v46 }
  0xae   :  { %2888 = vmatprep.mubr.msk.f32.mxu0 %vm130_vm1, %v1333_v0 }
  0xaf   :  { %2860 = vmatmul.mubr.msk.f32.gmra.mxu1 %vm130_vm1, %v3256_v57 }
  0xb0   :  { %2862 = vmatprep.mubr.msk.f32.mxu1 %vm130_vm1, %v3485_v5 }
  0xb1   :  { %2889 = vmatmul.mubr.msk.f32.gmra.mxu0 %vm130_vm1, %v2018_v20 }
  0xb3   :  { %2863 = vmatmul.mubr.msk.f32.gmra.mxu1 %vm130_vm1, %v1790_v37 }
  0xe1   :  { %v2661_v43 = vpop.f32.mrf.mxu0 }
  0xe2   :  { %v2673_v45 = vpop.f32.mrf.mxu1 }
  0xe3   :  { %v359_v50 = vpop.f32.mrf.mxu0 }
  0xe4   :  { %v399_v51 = vpop.f32.mrf.mxu1 }
  0xe5   :  { %v2664_v52 = vpop.f32.mrf.mxu0 }
  0xe6   :  { %v2676_v53 = vpop.f32.mrf.mxu1 }
  0xe7   :  { %v369_v55 = vpop.f32.mrf.mxu0 }
  0xe8   :  { %v409_v61 = vpop.f32.mrf.mxu1 }
  0xea   :  { %v2679_v62 = vpop.f32.mrf.mxu1 }
  0xec   :  { %v2667_v57 = vpop.f32.mrf.mxu0  ;;  %v419_v3 = vpop.f32.mrf.mxu1 }
  0xee   :  { %v379_v1 = vpop.f32.mrf.mxu0 }
  0xf0   :  { %v2670_v4 = vpop.f32.mrf.mxu0 }
  0xf2   :  { %v389_v7 = vpop.f32.mrf.mxu0 }
  0xf3   :  { %v2682_v6 = vpop.f32.mrf.mxu1 }
  0xf4   :  { %v2713_v9 = vpop.f32.mrf.mxu0 }
  0xf5   :  { %v3610_v8 = vpop.f32.mrf.mxu1 }
  0xf6   :  { %v767_v12 = vpop.f32.mrf.mxu0 }
  0xf7   :  { %v2687_v10 = vpop.f32.mrf.mxu1 }
  0xf8   :  { %v561_v11 = vadd.f32 %v2687_v10, %v2661_v43 }
  0xf9   :  { %v555_v13 = vpop.f32.mrf.mxu1  ;;  %v2716_v17 = vpop.f32.mrf.mxu0 }
  0xfa   :  { %v3612_v15 = vadd.f32 %v2713_v9, %v561_v11  ;;  %v556_v16 = vadd.f32 %v555_v13, %v359_v50 }
  0xfb   :  { %v2690_v18 = vpop.f32.mrf.mxu1  ;;  %v777_v21 = vpop.f32.mrf.mxu0 }
  0xfc   :  { %v3614_v19 = vadd.f32 %v767_v12, %v556_v16  ;;  %v571_v2 = vadd.f32 %v2690_v18, %v2664_v52 }
  0xfd   :  { %v565_v22 = vpop.f32.mrf.mxu1  ;;  %v2719_v25 = vpop.f32.mrf.mxu0 }
  0xfe   :  { %v3616_v23 = vadd.f32 %v2716_v17, %v571_v2  ;;  %v566_v24 = vadd.f32 %v565_v22, %v369_v55 }
  0xff   :  { %v2693_v26 = vpop.f32.mrf.mxu1  ;;  %v787_v30 = vpop.f32.mrf.mxu0 }
 0x100   :  { %v3618_v27 = vadd.f32 %v777_v21, %v566_v24  ;;  %v581_v29 = vadd.f32 %v2693_v26, %v2667_v57 }
 0x101   :  { %v575_v31 = vpop.f32.mrf.mxu1  ;;  %v2722_v34 = vpop.f32.mrf.mxu0 }
 0x102   :  { %v3620_v32 = vadd.f32 %v2719_v25, %v581_v29  ;;  %v576_v33 = vadd.f32 %v575_v31, %v379_v1 }
 0x103   :  { %v2696_v35 = vpop.f32.mrf.mxu1  ;;  %v797_v39 = vpop.f32.mrf.mxu0 }
 0x104   :  { %v3622_v36 = vadd.f32 %v787_v30, %v576_v33  ;;  %v591_v38 = vadd.f32 %v2696_v35, %v2670_v4 }
 0x105   :  { %v585_v40 = vpop.f32.mrf.mxu1  ;;  %v2725_v44 = vpop.f32.mrf.mxu0 }
 0x106   :  { %v3624_v41 = vadd.f32 %v2722_v34, %v591_v38  ;;  %v586_v42 = vadd.f32 %v585_v40, %v389_v7 }
 0x107   :  { %v2699_v46 = vpop.f32.mrf.mxu1  ;;  %v807_v63 = vpop.f32.mrf.mxu0 }
 0x108   :  { %v3626_v47 = vadd.f32 %v797_v39, %v586_v42  ;;  %v601_v48 = vadd.f32 %v2699_v46, %v2673_v45 }
 0x109   :  { %v595_v49 = vpop.f32.mrf.mxu1  ;;  %v2728_v56 = vpop.f32.mrf.mxu0 }
 0x10a   :  { %v3628_v54 = vadd.f32 %v2725_v44, %v601_v48  ;;  %v596_v5 = vadd.f32 %v595_v49, %v399_v51 }
 0x10b   :  { %v2702_v58 = vpop.f32.mrf.mxu1  ;;  %v817_v0 = vpop.f32.mrf.mxu0 }
 0x10c   :  { %v3630_v59 = vadd.f32 %v807_v63, %v596_v5  ;;  %v611_v60 = vadd.f32 %v2702_v58, %v2676_v53 }
 0x10d   :  { %v605_v14 = vpop.f32.mrf.mxu1  ;;  %v2731_v37 = vpop.f32.mrf.mxu0 }
 0x10e   :  { %v3632_v28 = vadd.f32 %v2728_v56, %v611_v60  ;;  %v606_v20 = vadd.f32 %v605_v14, %v409_v61 }
 0x10f   :  { %v2705_v43 = vpop.f32.mrf.mxu1  ;;  %v827_v52 = vpop.f32.mrf.mxu0 }
 0x110   :  { %v3634_v50 = vadd.f32 %v817_v0, %v606_v20  ;;  %v621_v45 = vadd.f32 %v2705_v43, %v2679_v62 }
 0x111   :  { %v615_v55 = vpop.f32.mrf.mxu1  ;;  %v2734_v1 = vpop.f32.mrf.mxu0 }
 0x112   :  { %v3636_v57 = vadd.f32 %v2731_v37, %v621_v45  ;;  %v616_v51 = vadd.f32 %v615_v55, %v419_v3 }
 0x113   :  { %v2708_v4 = vpop.f32.mrf.mxu1  ;;  %v837_v9 = vpop.f32.mrf.mxu0 }
 0x114   :  { %v3638_v7 = vadd.f32 %v827_v52, %v616_v51  ;;  %v631_v53 = vadd.f32 %v2708_v4, %v2682_v6 }
 0x115   :  { %v625_v10 = vpop.f32.mrf.mxu1  ;;  %v2765_v12 = vpop.f32.mrf.mxu0 }
 0x116   :  { %3843 = vst [vmem:[#allocation6_spill] sm:$0xff] %v3638_v7  ;;  %v3640_v11 = vadd.f32 %v2734_v1, %v631_v53  ;;  %v626_v61 = vadd.f32 %v625_v10, %v3610_v8 }
 0x117   :  { %v2739_v13 = vpop.f32.mrf.mxu1  ;;  %v1223_v62 = vpop.f32.mrf.mxu0 }
 0x118   :  { %3844 = vst [vmem:[#allocation7_spill] sm:$0xff] %v3640_v11  ;;  %v3643_v16 = vadd.f32 %v837_v9, %v626_v61  ;;  %v1075_v11 = vadd.f32 %v2739_v13, %v3612_v15 }
 0x119   :  { %v995_v17 = vpop.f32.mrf.mxu1  ;;  %v3645_v18 = vpop.f32.mrf.mxu0 }
 0x11a   :  { %3845 = vst [vmem:[#allocation8_spill] sm:$0xff] %v3643_v16  ;;  %v1074_v7 = vadd.f32 %v995_v17, %v3614_v19 }
 0x11b   :  { %v2742_v3 = vpop.f32.mrf.mxu1  ;;  %v3647_v2 = vpop.f32.mrf.mxu0 }
 0x11d   :  { %v1005_v21 = vpop.f32.mrf.mxu1  ;;  %v3649_v22 = vpop.f32.mrf.mxu0 }
 0x11e   :  { %v1076_v15 = vadd.f32 %v1005_v21, %v3618_v27 }
 0x11f   :  { %v2745_v6 = vpop.f32.mrf.mxu1  ;;  %v3651_v24 = vpop.f32.mrf.mxu0 }
 0x121   :  { %v1015_v25 = vpop.f32.mrf.mxu1  ;;  %v3653_v26 = vpop.f32.mrf.mxu0 }
 0x123   :  { %v3655_v8 = vpop.f32.mrf.mxu1  ;;  %v3657_v29 = vpop.f32.mrf.mxu0 }
 0x125   :  { %v3659_v30 = vpop.f32.mrf.mxu1  ;;  %v3661_v31 = vpop.f32.mrf.mxu0 }
 0x127   :  { %v3663_v33 = vpop.f32.mrf.mxu1  ;;  %v3665_v34 = vpop.f32.mrf.mxu0 }
 0x129   :  { %v3667_v35 = vpop.f32.mrf.mxu1  ;;  %v3669_v38 = vpop.f32.mrf.mxu0 }
 0x12b   :  { %v3671_v39 = vpop.f32.mrf.mxu1  ;;  %v3673_v40 = vpop.f32.mrf.mxu0 }
 0x12c   :  { %3846 = vst [vmem:[#allocation9_spill] sm:$0xff] %v3673_v40 }
 0x12d   :  { %v3675_v42 = vpop.f32.mrf.mxu1  ;;  %v3677_v44 = vpop.f32.mrf.mxu0 }
 0x12e   :  { %3847 = vst [vmem:[#allocation10_spill] sm:$0xff] %v3677_v44 }
 0x12f   :  { %v3679_v46 = vpop.f32.mrf.mxu1  ;;  %v3681_v48 = vpop.f32.mrf.mxu0 }
 0x130   :  { %3848 = vst [vmem:[#allocation11_spill] sm:$0xff] %v3681_v48 }
 0x131   :  { %v3683_v63 = vpop.f32.mrf.mxu1  ;;  %v3685_v49 = vpop.f32.mrf.mxu0 }
 0x132   :  { %3849 = vst [vmem:[#allocation12_spill] sm:$0xff] %v3683_v63  ;;  %3850 = vst [vmem:[#allocation13_spill] sm:$0xff] %v3685_v49 }
 0x133   :  { %v3687_v5 = vpop.f32.mrf.mxu1  ;;  %v3689_v56 = vpop.f32.mrf.mxu0 }
 0x134   :  { %3851 = vst [vmem:[#allocation14_spill] sm:$0xff] %v3687_v5  ;;  %3852 = vst [vmem:[#allocation15_spill] sm:$0xff] %v3689_v56 }
 0x135   :  { %v3691_v58 = vpop.f32.mrf.mxu1  ;;  %v2817_v60 = vpop.f32.mrf.mxu0 }
 0x136   :  { %3853 = vst [vmem:[#allocation16_spill] sm:$0xff] %v3691_v58 }
 0x137   :  { %v2791_v0 = vpop.f32.mrf.mxu1  ;;  %v1680_v14 = vpop.f32.mrf.mxu0 }
 0x139   :  { %v1451_v20 = vpop.f32.mrf.mxu1  ;;  %v2820_v37 = vpop.f32.mrf.mxu0 }
 0x13b   :  { %v2794_v43 = vpop.f32.mrf.mxu1  ;;  %v1690_v45 = vpop.f32.mrf.mxu0 }
 0x13d   :  { %v1461_v52 = vpop.f32.mrf.mxu1  ;;  %v3693_v55 = vpop.f32.mrf.mxu0 }
 0x13f   :  { %v2797_v51 = vpop.f32.mrf.mxu1  ;;  %v3695_v1 = vpop.f32.mrf.mxu0 }
 0x141   :  { %v1471_v4 = vpop.f32.mrf.mxu1  ;;  %v3697_v53 = vpop.f32.mrf.mxu0 }
 0x143   :  { %v3699_v9 = vpop.f32.mrf.mxu1  ;;  %v3701_v10 = vpop.f32.mrf.mxu0 }
 0x144   :  { %3854 = vst [vmem:[#allocation17_spill] sm:$0xff] %v3701_v10  ;;  %v1303_v10 = vadd.f32 %v2765_v12, %v1075_v11 }
 0x145   :  { %v3703_v61 = vpop.f32.mrf.mxu1  ;;  %v3705_v56 = vpop.f32.mrf.mxu0 }
 0x146   :  { %3855 = vst [vmem:[#allocation18_spill] sm:$0xff] %v3705_v56  ;;  %v1531_v13 = vadd.f32 %v2791_v0, %v1303_v10 }
 0x147   :  { %v3707_v49 = vpop.f32.mrf.mxu1  ;;  %v3709_v58 = vpop.f32.mrf.mxu0 }
 0x148   :  { %3856 = vst [vmem:[#allocation19_spill] sm:$0xff] %v3709_v58  ;;  %v1077_v58 = vadd.f32 %v2742_v3, %v3616_v23  ;;  %v1078_v23 = vadd.f32 %v1015_v25, %v3622_v36  ;;  %v1080_v36 = vadd.f32 %v3659_v30, %v3626_v47 }
 0x149   :  { %v3711_v16 = vpop.f32.mrf.mxu1  ;;  %v3713_v48 = vpop.f32.mrf.mxu0 }
 0x14a   :  { %3857 = vst [vmem:[#allocation20_spill] sm:$0xff] %v3711_v16  ;;  %3858 = vst [vmem:[#allocation21_spill] sm:$0xff] %v3713_v48  ;;  %v1305_v17 = vadd.f32 %v3645_v18, %v1077_v58 }
 0x14b   :  { %v3715_v5 = vpop.f32.mrf.mxu1  ;;  %v3718_v44 = vpop.f32.mrf.mxu0 }
 0x14c   :  { %3859 = vst [vmem:[#allocation22_spill] sm:$0xff] %v3715_v5  ;;  %3860 = vst [vmem:[#allocation23_spill] sm:$0xff] %v3718_v44  ;;  %v1302_v5 = vadd.f32 %v1223_v62, %v1074_v7  ;;  %v1304_v7 = vadd.f32 %v3647_v2, %v1076_v15  ;;  %v1760_v62 = vadd.f32 %v2817_v60, %v1531_v13  ;;  %v3754_v2 = vld [vmem:[%s3841_s2] ss:$0 sm:$0xff]  ;;  %s2920_s2 = smov [#allocation3]  }
 0x14d   :  { %v3720_v63 = vpop.f32.mrf.mxu1  ;;  %v3723_v40 = vpop.f32.mrf.mxu0  ;;  %v1533_v27 = vadd.f32 %v2794_v43, %v1305_v17  ;;  %v1308_v15 = vadd.f32 %v3657_v29, %v1080_v36  ;;  %s2291_s23 = sshll.u32 %s2920_s2, 4  ;;  %s2292_s23 = int_to_ptr.vmem [resolvable:$true] %s2291_s23 }
 0x14e   :  { %3861 = vst [vmem:[#allocation24_spill] sm:$0xff] %v3720_v63  ;;  %3862 = vst [vmem:[#allocation25_spill] sm:$0xff] %v3723_v40  ;;  %v1079_v63 = vadd.f32 %v2745_v6, %v3620_v32  ;;  %v1530_v40 = vadd.f32 %v1451_v20, %v1302_v5  ;;  %v1081_v32 = vadd.f32 %v3655_v8, %v3624_v41  ;;  %s2897_s24 = scalar_lea.vmem %s2292_s23, 2048  ;;  %p2902_p1 = scmp.lt.s32.totalorder %s2292_s23, %s2292_s23 }
 0x14f   :  { %v3725_v56 = vpop.f32.mrf.mxu1  ;;  %v3728_v16 = vpop.f32.mrf.mxu0  ;;  %v1532_v18 = vadd.f32 %v1461_v52, %v1304_v7  ;;  %v1306_v20 = vadd.f32 %v3651_v24, %v1078_v23  ;;  %p2898_p0 = scmp.ne.s32.totalorder %s2292_s23, %s2897_s24  ;;  %p2903_p2 = scmp.lt.s32.totalorder %s2897_s24, %s2897_s24 }
 0x150   :  { %v1307_v21 = vadd.f32 %v3649_v22, %v1079_v63  ;;  %v1759_v0 = vadd.f32 %v1680_v14, %v1530_v40  ;;  %v1762_v63 = vadd.f32 %v2820_v37, %v1533_v27  ;;  %v1309_v40 = vadd.f32 %v3653_v26, %v1081_v32 }
 0x151   :  { %v3730_v48 = vpop.f32.mrf.mxu1  ;;  %v3733_v44 = vpop.f32.mrf.mxu0  ;;  %v1083_v14 = vadd.f32 %v3663_v33, %v3628_v54  ;;  %v1534_v24 = vadd.f32 %v1471_v4, %v1306_v20  ;;  %v1761_v47 = vadd.f32 %v1690_v45, %v1532_v18  ;;  %v1082_v37 = vadd.f32 %v3667_v35, %v3630_v59  ;;  %v3863_v20 = vld [vmem:[#allocation17_spill] sm:$0xff]  ;;  %p2904_p3 = por %p2903_p2, %p2902_p1 }
 0x152   :  { %v1535_v25 = vadd.f32 %v2797_v51, %v1307_v21  ;;  %v1537_v26 = vadd.f32 %v3699_v9, %v1309_v40  ;;  %v1536_v59 = vadd.f32 %v3703_v61, %v1308_v15  ;;  %v3866_v40 = vld [vmem:[#allocation6_spill] sm:$0xff] }
 0x153   :  { %v3736_v19 = vpop.f32.mrf.mxu1  ;;  %v3739_v11 = vpop.f32.mrf.mxu0  ;;  %v1311_v7 = vadd.f32 %v3661_v31, %v1083_v14  ;;  %v1763_v29 = vadd.f32 %v3695_v1, %v1534_v24  ;;  %v1310_v32 = vadd.f32 %v3665_v34, %v1082_v37  ;;  %v1084_v31 = vadd.f32 %v3675_v42, %v3634_v50  ;;  %v3864_v42 = vld [vmem:[#allocation20_spill] sm:$0xff]  ;;  %v3868_v24 = vld [vmem:[#allocation18_spill] sm:$0xff]  ;;  %p2905_p4 = pnand %p2904_p3, %p2898_p0 }
 0x154   :  { %v1764_v13 = vadd.f32 %v3693_v55, %v1535_v25  ;;  %v1087_v34 = vadd.f32 %v3679_v46, %v3636_v57  ;;  %v1765_v50 = vadd.f32 %v3863_v20, %v1536_v59  ;;  %v3869_v46 = vld [vmem:[#allocation22_spill] sm:$0xff]  ;;  %v3880_v20 = vld [vmem:[#allocation23_spill] sm:$0xff] }
 0x155   :  { %v3742_v12 = vpop.f32.mrf.mxu1  ;;  %v2869_v3 = vpop.f32.mrf.mxu0  ;;  %v3870_v37 = vld [vmem:[#allocation10_spill] sm:$0xff] }
 0x157   :  { %v2843_v6 = vpop.f32.mrf.mxu1  ;;  %v2136_v58 = vpop.f32.mrf.mxu0 }
 0x158   :  { %v1988_v5 = vadd.f32 %v2843_v6, %v1760_v62  ;;  %v1085_v62 = vadd.f32 %v3671_v39, %v3632_v28  ;;  %v1766_v28 = vadd.f32 %v3697_v53, %v1537_v26  ;;  %v1539_v39 = vadd.f32 %v3707_v49, %v1311_v7  ;;  %v3871_v26 = vld [vmem:[#allocation7_spill] sm:$0xff] }
 0x159   :  { %v1908_v22 = vpop.f32.mrf.mxu1  ;;  %v2872_v8 = vpop.f32.mrf.mxu0  ;;  %v1538_v53 = vadd.f32 %v3864_v42, %v1310_v32 }
 0x15a   :  { %v2216_v60 = vadd.f32 %v2869_v3, %v1988_v5  ;;  %v1987_v41 = vadd.f32 %v1908_v22, %v1759_v0  ;;  %v1768_v57 = vadd.f32 %v3868_v24, %v1539_v39 }
 0x15b   :  { %v2846_v43 = vpop.f32.mrf.mxu1  ;;  %v2146_v10 = vpop.f32.mrf.mxu0 }
 0x15c   :  { %v2238_v30 = vadd.f32 %v3754_v2, %v2216_v60  ;;  %v2215_v52 = vadd.f32 %v2136_v58, %v1987_v41  ;;  %v1990_v51 = vadd.f32 %v2846_v43, %v1762_v63  ;;  %v1313_v58 = vadd.f32 %v3669_v38, %v1085_v62  ;;  %v3865_v41 = vld [vmem:[#allocation9_spill] sm:$0xff]  ;;  %v3867_v38 = vld [vmem:[#allocation12_spill] sm:$0xff] }
 0x15d   :  { %v1918_v17 = vpop.f32.mrf.mxu1  ;;  %v2875_v23 = vpop.f32.mrf.mxu0  ;;  %v1086_v14 = vadd.f32 %v3867_v38, %v3866_v40 }
 0x15e   :  { %v2254_v54 = vmax.f32 %v2238_v30, 0.0  ;;  %v2237_v33 = vadd.f32 %v3754_v2, %v2215_v52  ;;  %v2218_v4 = vadd.f32 %v2872_v8, %v1990_v51  ;;  %v1989_v45 = vadd.f32 %v1918_v17, %v1761_v47  ;;  %v3872_v17 = vld [vmem:[#allocation14_spill] sm:$0xff] }
 0x15f   :  { %v2849_v35 = vpop.f32.mrf.mxu1  ;;  %v2156_v21 = vpop.f32.mrf.mxu0  ;;  %v1312_v8 = vadd.f32 %v3865_v41, %v1084_v31  ;;  %v1541_v43 = vadd.f32 %v3869_v46, %v1313_v58  ;;  %v3878_v31 = vld [vmem:[#allocation21_spill] sm:$0xff] }
 0x160   :  { %2271 = vst.msk [vmem:[#allocation3 + $0x8] sm:$0xff] %vm2269_vm4, %v2254_v54  ;;  %v2253_v55 = vmax.f32 %v2237_v33, 0.0  ;;  %v2240_v9 = vadd.f32 %v3754_v2, %v2218_v4  ;;  %v2217_v27 = vadd.f32 %v2146_v10, %v1989_v45  ;;  %v1992_v3 = vadd.f32 %v2849_v35, %v1764_v13  ;;  %v3873_v33 = vld [vmem:[#allocation19_spill] sm:$0xff]  ;;  %v3874_v45 = vld [vmem:[#allocation24_spill] sm:$0xff]  ;;  %v3879_v58 = vld [vmem:[#allocation13_spill] sm:$0xff] }
 0x161   :  { %v1928_v1 = vpop.f32.mrf.mxu1  ;;  %v2878_v5 = vpop.f32.mrf.mxu0  ;;  %v1315_v13 = vadd.f32 %v3870_v37, %v1087_v34  ;;  %v1089_v54 = vadd.f32 %v3872_v17, %v3871_v26  ;;  %v1767_v4 = vadd.f32 %v3873_v33, %v1538_v53  ;;  %v3882_v41 = vld [vmem:[#allocation25_spill] sm:$0xff] }
 0x162   :  { %2270 = vst.msk [vmem:[#allocation3] sm:$0xff] %vm2269_vm4, %v2253_v55  ;;  %v2256_v61 = vmax.f32 %v2240_v9, 0.0  ;;  %v2239_v6 = vadd.f32 %v3754_v2, %v2217_v27  ;;  %v2220_v0 = vadd.f32 %v2875_v23, %v1992_v3  ;;  %v1991_v18 = vadd.f32 %v1928_v1, %v1763_v29  ;;  %v3875_v9 = vld [vmem:[#allocation11_spill] sm:$0xff]  ;;  %v3876_v3 = vld [vmem:[#allocation8_spill] sm:$0xff] }
 0x163   :  { %v2852_v36 = vpop.f32.mrf.mxu1  ;;  %v2166_v60 = vpop.f32.mrf.mxu0  ;;  %v1540_v23 = vadd.f32 %v3874_v45, %v1312_v8  ;;  %v1314_v27 = vadd.f32 %v3875_v9, %v1086_v14  ;;  %v1543_v39 = vadd.f32 %v3725_v56, %v1315_v13  ;;  %v1317_v34 = vadd.f32 %v3879_v58, %v1089_v54 }
 0x164   :  { %2273 = vst.msk [vmem:[#allocation3 + $0x18] sm:$0xff] %vm2269_vm4, %v2256_v61  ;;  %v2255_v49 = vmax.f32 %v2239_v6, 0.0  ;;  %v2242_v25 = vadd.f32 %v3754_v2, %v2220_v0  ;;  %v2219_v22 = vadd.f32 %v2156_v21, %v1991_v18  ;;  %v1994_v63 = vadd.f32 %v2852_v36, %v1766_v28  ;;  %v3877_v21 = vld [vmem:[#allocation16_spill] sm:$0xff] }
 0x165   :  { %v1938_v47 = vpop.f32.mrf.mxu1  ;;  %v2881_v15 = vpop.f32.mrf.mxu0  ;;  %v1088_v32 = vadd.f32 %v3877_v21, %v3876_v3  ;;  %v1770_v28 = vadd.f32 %v3878_v31, %v1541_v43  ;;  %v1542_v42 = vadd.f32 %v3730_v48, %v1314_v27  ;;  %v1772_v8 = vadd.f32 %v3882_v41, %v1543_v39 }
 0x166   :  { %2272 = vst.msk [vmem:[#allocation3 + $0x10] sm:$0xff] %vm2269_vm4, %v2255_v49  ;;  %v2258_v30 = vmax.f32 %v2242_v25, 0.0  ;;  %v2241_v52 = vadd.f32 %v3754_v2, %v2219_v22  ;;  %v2222_v51 = vadd.f32 %v2878_v5, %v1994_v63  ;;  %v1993_v10 = vadd.f32 %v1938_v47, %v1765_v50  ;;  %v3881_v63 = vld [vmem:[#allocation15_spill] sm:$0xff] }
 0x167   :  { %v2855_v7 = vpop.f32.mrf.mxu1  ;;  %v2176_v55 = vpop.f32.mrf.mxu0  ;;  %v1769_v50 = vadd.f32 %v3880_v20, %v1540_v23  ;;  %v1545_v40 = vadd.f32 %v3736_v19, %v1317_v34  ;;  %v1771_v43 = vadd.f32 %v3728_v16, %v1542_v42 }
 0x168   :  { %2275 = vst.msk [vmem:[#allocation3 + $0x28] sm:$0xff] %vm2269_vm4, %v2258_v30  ;;  %v2257_v62 = vmax.f32 %v2241_v52, 0.0  ;;  %v2244_v29 = vadd.f32 %v3754_v2, %v2222_v51  ;;  %v2221_v59 = vadd.f32 %v2166_v60, %v1993_v10  ;;  %v1996_v35 = vadd.f32 %v2855_v7, %v1768_v57 }
 0x169   :  { %v1948_v1 = vpop.f32.mrf.mxu1  ;;  %v2884_v5 = vpop.f32.mrf.mxu0  ;;  %v1316_v60 = vadd.f32 %v3881_v63, %v1088_v32  ;;  %v1774_v37 = vadd.f32 %v3733_v44, %v1545_v40 }
 0x16a   :  { %2274 = vst.msk [vmem:[#allocation3 + $0x20] sm:$0xff] %vm2269_vm4, %v2257_v62  ;;  %v2260_v61 = vmax.f32 %v2244_v29, 0.0  ;;  %v2243_v6 = vadd.f32 %v3754_v2, %v2221_v59  ;;  %v2224_v0 = vadd.f32 %v2881_v15, %v1996_v35  ;;  %v1995_v18 = vadd.f32 %v1948_v1, %v1767_v4 }
 0x16b   :  { %v2858_v53 = vpop.f32.mrf.mxu1  ;;  %v2186_v22 = vpop.f32.mrf.mxu0  ;;  %v1544_v47 = vadd.f32 %v3742_v12, %v1316_v60 }
 0x16c   :  { %2277 = vst.msk [vmem:[#allocation3 + $0x38] sm:$0xff] %vm2269_vm4, %v2260_v61  ;;  %v2259_v36 = vmax.f32 %v2243_v6, 0.0  ;;  %v2246_v56 = vadd.f32 %v3754_v2, %v2224_v0  ;;  %v2223_v49 = vadd.f32 %v2176_v55, %v1995_v18  ;;  %v1998_v25 = vadd.f32 %v2858_v53, %v1770_v28 }
 0x16d   :  { %v1958_v38 = vpop.f32.mrf.mxu1  ;;  %v2887_v46 = vpop.f32.mrf.mxu0  ;;  %v1773_v12 = vadd.f32 %v3739_v11, %v1544_v47 }
 0x16e   :  { %2276 = vst.msk [vmem:[#allocation3 + $0x30] sm:$0xff] %vm2269_vm4, %v2259_v36  ;;  %v2262_v14 = vmax.f32 %v2246_v56, 0.0  ;;  %v2245_v48 = vadd.f32 %v3754_v2, %v2223_v49  ;;  %v2226_v24 = vadd.f32 %v2884_v5, %v1998_v25  ;;  %v1997_v57 = vadd.f32 %v1958_v38, %v1769_v50 }
 0x16f   :  { %v2861_v30 = vpop.f32.mrf.mxu1  ;;  %v2196_v15 = vpop.f32.mrf.mxu0 }
 0x170   :  { %2279 = vst.msk [vmem:[#allocation3 + $0x48] sm:$0xff] %vm2269_vm4, %v2262_v14  ;;  %v2261_v52 = vmax.f32 %v2245_v48, 0.0  ;;  %v2248_v51 = vadd.f32 %v3754_v2, %v2226_v24  ;;  %v2225_v19 = vadd.f32 %v2186_v22, %v1997_v57  ;;  %v2000_v10 = vadd.f32 %v2861_v30, %v1772_v8 }
 0x171   :  { %v1968_v13 = vpop.f32.mrf.mxu1  ;;  %v2890_v4 = vpop.f32.mrf.mxu0 }
 0x172   :  { %2278 = vst.msk [vmem:[#allocation3 + $0x40] sm:$0xff] %vm2269_vm4, %v2261_v52  ;;  %v2264_v26 = vmax.f32 %v2248_v51, 0.0  ;;  %v2247_v17 = vadd.f32 %v3754_v2, %v2225_v19  ;;  %v2228_v16 = vadd.f32 %v2887_v46, %v2000_v10  ;;  %v1999_v54 = vadd.f32 %v1968_v13, %v1771_v43 }
 0x173   :  { %v2864_v33 = vpop.f32.mrf.mxu1  ;;  %v2206_v9 = vpop.f32.mrf.mxu0 }
 0x174   :  { %2281 = vst.msk [vmem:[#allocation3 + $0x58] sm:$0xff] %vm2269_vm4, %v2264_v26  ;;  %v2263_v45 = vmax.f32 %v2247_v17, 0.0  ;;  %v2250_v23 = vadd.f32 %v3754_v2, %v2228_v16  ;;  %v2227_v7 = vadd.f32 %v2196_v15, %v1999_v54  ;;  %v2002_v62 = vadd.f32 %v2864_v33, %v1774_v37 }
 0x175   :  { %v1978_v44 = vpop.f32.mrf.mxu1 }
 0x176   :  { %2280 = vst.msk [vmem:[#allocation3 + $0x50] sm:$0xff] %vm2269_vm4, %v2263_v45  ;;  %v2266_v29 = vmax.f32 %v2250_v23, 0.0  ;;  %v2249_v59 = vadd.f32 %v3754_v2, %v2227_v7  ;;  %v2230_v35 = vadd.f32 %v2890_v4, %v2002_v62  ;;  %v2001_v55 = vadd.f32 %v1978_v44, %v1773_v12 }
 0x178   :  { %2283 = vst.msk [vmem:[#allocation3 + $0x68] sm:$0xff] %vm2269_vm4, %v2266_v29  ;;  %v2265_v11 = vmax.f32 %v2249_v59, 0.0  ;;  %v2252_v27 = vadd.f32 %v3754_v2, %v2230_v35  ;;  %v2229_v3 = vadd.f32 %v2206_v9, %v2001_v55 }
 0x17a   :  { %2282 = vst.msk [vmem:[#allocation3 + $0x60] sm:$0xff] %vm2269_vm4, %v2265_v11  ;;  %v2268_v21 = vmax.f32 %v2252_v27, 0.0  ;;  %v2251_v32 = vadd.f32 %v3754_v2, %v2229_v3 }
 0x17c   :  { %2285 = vst.msk [vmem:[#allocation3 + $0x78] sm:$0xff] %vm2269_vm4, %v2268_v21  ;;  %v2267_v31 = vmax.f32 %v2251_v32, 0.0 }
 0x17e   :  { %2284 = vst.msk [vmem:[#allocation3 + $0x70] sm:$0xff] %vm2269_vm4, %v2267_v31 }
 0x17f   :  { %2908 = shalt.err (!%p2905_p4)
}
 0x180   :  { %s2921_s25 = smov 128   ;;  %s2922_s26 = smov 8  }
 0x181   :  { %2297 = dma.vmem_to_hbm [thread:$0]  %s2292_s23, 2048, %s3842_s3, [#allocation4], %s2921_s25, %s2921_s25, %s2922_s26  }
 0x182   :  { %2917 = dma.done.wait [#allocation4], 2048  }
 0x183   :  { %2918 = vsyncadd [#allocation4], 4294965248 }
 0x184   :  { %2301 = vsyncpa [#allocation4], 1 }

</bundles_post_ra>
